<compile_context>
chip_gen: v6e
topology: v6e:2x2x1
jax: 0.10.0
libtpu: 0.0.40
codegen_flags: <defaults>
</compile_context>

<pallas_src>
import math
from functools import partial

import jax
import jax.numpy as jnp
from jax.experimental import pallas as pl
from jax.experimental.pallas import tpu as pltpu

EPS = 1e-6
LANE = 128


def make_divisible(v, divisor=8, min_value=None, round_limit=0.9):
    min_value = min_value or divisor
    new_v = max(min_value, int(v + divisor / 2) // divisor * divisor)
    if new_v < round_limit * v:
        new_v += divisor
    return new_v


def _gelu(x, approx=False):
    if approx:
        # tanh approximation -> EUP slot (nearly free next to VALU/MXU)
        return jax.nn.gelu(x, approximate=True)
    # exact (erf-based) GELU, matching torch.nn.GELU default
    return 0.5 * x * (1.0 + jax.lax.erf(x * (1.0 / math.sqrt(2.0))))


def _lane_pad(c):
    return ((int(c) + LANE - 1) // LANE) * LANE


def _pad_to(a, shape):
    return jnp.pad(a, [(0, t - s) for s, t in zip(a.shape, shape)])


def _vmem_limit_bytes(frac=0.8):
    cap = 128 * 1024 * 1024
    try:  # ~102 MiB on 128 MiB parts (v5e/v6e), ~51 MiB on 64 MiB v7x
        cap = int(getattr(pltpu.get_tpu_info(), "vmem_capacity_bytes", cap))
    except Exception:
        pass
    return int(cap * frac)


def _pick_tile_h(H, W, cin_p, cmid_p, cout_p, budget_bytes):
    """Largest divisor of H whose rough per-step f32 VMEM footprint fits."""
    best = 1
    w_scr = ((W + 9 + 7) // 8) * 8
    for th in range(1, H + 1):
        if H % th:
            continue
        est = 4 * ((th + 2) * w_scr * cmid_p              # depthwise scratch
                   + 4 * th * W * cmid_p                  # live h / acc temps
                   + 2 * 2 * th * W * (cin_p + cout_p))   # 2x-buffered I/O
        if est <= budget_bytes:
            best = th
    return best


def mbconv_ln_kernel(x_ref, xh_ref, w1_ref, b1_ref, wdw_ref, bdw_ref,
                     w3_ref, ws_ref, b3s_ref, o_ref, hp_ref,
                     *, tile_h, W, cin, cin_p, inv_cin, approx_gelu):
    """One (image, row-block) per grid step; activations are (rows, C) lane-dense."""
    TH = tile_h
    cmid = w1_ref.shape[1]
    cout = w3_ref.shape[1]
    r = pl.program_id(1)
    n_r = pl.num_programs(1)
    f32 = jnp.float32

    # --- LayerNorm2d (two-pass, padded lanes masked) + conv1 1x1 + GELU -----
    # LN affine is folded into w1/b1 in the wrapper.
    if cin == cin_p:
        lane_mask = None
    else:
        lane_mask = (jax.lax.broadcasted_iota(jnp.int32, (1, cin_p), 1)
                     < cin).astype(f32)

    def ln_conv1_gelu(x_rows):                       # x_rows: (rows, cin_p) f32
        mu = jnp.sum(x_rows, axis=-1, keepdims=True) * inv_cin
        xc = x_rows - mu
        if lane_mask is not None:
            xc = xc * lane_mask                      # keep padded lanes at zero
        var = jnp.sum(xc * xc, axis=-1, keepdims=True) * inv_cin
        xn = xc * jax.lax.rsqrt(var + EPS)
        h = jnp.dot(xn.astype(w1_ref.dtype), w1_ref[...],
                    preferred_element_type=f32) + b1_ref[...]
        return _gelu(h, approx_gelu)

    x_raw = x_ref[0].reshape(TH * W, cin_p)          # interior rows, HBM dtype
    # 1x1-conv shortcut first so x's live range ends before the depthwise.
    # Its bias is folded into b3s (added once at the end).
    sc = jnp.dot(x_raw.astype(ws_ref.dtype), ws_ref[...],
                 preferred_element_type=f32)

    h_int = ln_conv1_gelu(x_raw.astype(f32)).reshape(TH, W, cmid)
    h_halo = ln_conv1_gelu(
        xh_ref[0].reshape(2 * W, cin_p).astype(f32)).reshape(2, W, cmid)

    # --- conv2 3x3 depthwise, stride 1, pad 1, via zero-ring VMEM scratch ---
    # Columns [8, 8+W) hold the activation (sublane-aligned store); columns 7
    # and 8+W are the zero halo ring; rows 0 / TH+1 hold the neighbouring row
    # blocks' edge rows, zeroed when the block touches the image boundary.
    # Only the ring is (re)zeroed each step — the interior is fully overwritten.
    zcol = jnp.zeros((TH + 2, 1, cmid), f32)
    hp_ref[pl.ds(0, TH + 2), pl.ds(7, 1), :] = zcol
    hp_ref[pl.ds(0, TH + 2), pl.ds(8 + W, 1), :] = zcol
    hp_ref[pl.ds(1, TH), pl.ds(8, W), :] = h_int
    hp_ref[pl.ds(0, 1), pl.ds(8, W), :] = h_halo[0:1]
    hp_ref[pl.ds(TH + 1, 1), pl.ds(8, W), :] = h_halo[1:2]

    zrow = jnp.zeros((1, W, cmid), f32)

    @pl.when(r == 0)
    def _():                                        # top halo row is outside image
        hp_ref[pl.ds(0, 1), pl.ds(8, W), :] = zrow

    @pl.when(r == n_r - 1)
    def _():                                        # bottom halo row outside image
        hp_ref[pl.ds(TH + 1, 1), pl.ds(8, W), :] = zrow

    # Centre tap (dy=1, dx=1) straight from registers; bias folded into init.
    acc = h_int * wdw_ref[4] + bdw_ref[0]
    for t in (0, 1, 2, 3, 5, 6, 7, 8):
        dy, dx = divmod(t, 3)
        acc = acc + hp_ref[pl.ds(dy, TH), pl.ds(7 + dx, W), :] * wdw_ref[t]
    hdw = _gelu(acc, approx_gelu).reshape(TH * W, cmid)

    # --- conv3 1x1 project + shortcut + combined (b3 + bs) bias -------------
    y = jnp.dot(hdw.astype(w3_ref.dtype), w3_ref[...],
                preferred_element_type=f32)
    # drop_path(p=0) is identity; lane-dense store (Cout padded to 128 lanes)
    o_ref[0] = (y + sc + b3s_ref[...]).reshape(TH, W, cout).astype(o_ref.dtype)


def mbconv_ln_block(x_nchw, params, mxu_dtype=jnp.bfloat16, tile_h=None,
                    approx_gelu=False):
    """Forward pass of MbConvLNBlock (stride=1, in_chs != out_chs path)."""
    N, Cin, H, W = x_nchw.shape
    Cmid = params['w1'].shape[1]
    Cout = params['w3'].shape[1]
    Cin_p, Cmid_p, Cout_p = _lane_pad(Cin), _lane_pad(Cmid), _lane_pad(Cout)
    f32 = jnp.float32

    vmem_limit = _vmem_limit_bytes()
    if tile_h is None:
        tile_h = _pick_tile_h(H, W, Cin_p, Cmid_p, Cout_p, vmem_limit // 2)
    assert H % tile_h == 0, (H, tile_h)
    nR = H // tile_h

    # --- fold / pad weights once (LN affine -> conv1, bs -> b3) -------------
    ln_w = params['ln_w'].reshape(Cin, 1).astype(f32)
    ln_b = params['ln_b'].reshape(1, Cin).astype(f32)
    w1 = params['w1'].astype(f32)
    w1f = _pad_to(ln_w * w1, (Cin_p, Cmid_p)).astype(mxu_dtype)
    b1f = _pad_to(params['b1'].astype(f32) + ln_b @ w1, (1, Cmid_p))
    wdw = _pad_to(params['wdw'].astype(f32), (9, Cmid_p))
    bdw = _pad_to(params['bdw'].astype(f32), (1, Cmid_p))
    w3p = _pad_to(params['w3'].astype(f32), (Cmid_p, Cout_p)).astype(mxu_dtype)
    wsp = _pad_to(params['ws'].astype(f32), (Cin_p, Cout_p)).astype(mxu_dtype)
    b3s = _pad_to(params['b3'].astype(f32) + params['bs'].astype(f32),
                  (1, Cout_p))

    # --- activations: NCHW -> NHWC, lane-pad channels, bf16 through HBM -----
    # NOTE: for tiny Cin (e.g. 4) the pad to 128 amplifies HBM reads / MXU K;
    # acceptable for production Cin>=64, see review note.
    act_dtype = mxu_dtype if mxu_dtype == jnp.bfloat16 else x_nchw.dtype
    x_p = jnp.transpose(x_nchw, (0, 2, 3, 1))
    x_p = _pad_to(x_p, (N, H, W, Cin_p)).astype(act_dtype)

    # Per-row-block 1-row halos (rows above/below the block; zeros at the edge).
    xp_hpad = jnp.pad(x_p, ((0, 0), (1, 1), (0, 0), (0, 0)))
    top_idx = jnp.arange(nR) * tile_h              # padded-row index of row above
    bot_idx = top_idx + tile_h + 1                 # padded-row index of row below
    x_halo = jnp.stack([jnp.take(xp_hpad, top_idx, axis=1),
                        jnp.take(xp_hpad, bot_idx, axis=1)], axis=2)
    x_halo = x_halo.reshape(N * nR, 2, W, Cin_p)

    kernel = partial(mbconv_ln_kernel, tile_h=tile_h, W=W, cin=Cin,
                     cin_p=Cin_p, inv_cin=1.0 / Cin, approx_gelu=approx_gelu)
    # TODO(synk): pipeline_mode=pl.Buffered(1) on these constant specs (v7x VMEM)
    const = lambda shape: pl.BlockSpec(shape, lambda n, r: (0,) * len(shape))
    w_scr = ((W + 9 + 7) // 8) * 8

    out = pl.pallas_call(
        kernel,
        out_shape=jax.ShapeDtypeStruct((N, H, W, Cout_p), x_nchw.dtype),
        grid=(N, nR),
        in_specs=[
            pl.BlockSpec((1, tile_h, W, Cin_p), lambda n, r: (n, r, 0, 0)),
            pl.BlockSpec((1, 2, W, Cin_p), lambda n, r: (n * nR + r, 0, 0, 0)),
            const((Cin_p, Cmid_p)), const((1, Cmid_p)),   # conv1 (LN folded)
            const((9, Cmid_p)), const((1, Cmid_p)),       # dw 3x3 w, b
            const((Cmid_p, Cout_p)),                      # conv3 w
            const((Cin_p, Cout_p)),                       # shortcut w
            const((1, Cout_p)),                           # b3 + bs combined
        ],
        out_specs=pl.BlockSpec((1, tile_h, W, Cout_p), lambda n, r: (n, r, 0, 0)),
        scratch_shapes=[pltpu.VMEM((tile_h + 2, w_scr, Cmid_p), jnp.float32)],
        compiler_params=pltpu.CompilerParams(
            dimension_semantics=("parallel", "parallel"),
            vmem_limit_bytes=vmem_limit),
    )(x_p, x_halo, w1f, b1f, wdw, bdw, w3p, wsp, b3s)

    out = out[..., :Cout]                                # drop lane padding
    return jnp.transpose(out, (0, 3, 1, 2))              # NHWC -> NCHW


def reference(x_nchw, params):
    """Pure-JAX (XLA conv) reference for correctness checking."""
    x = jnp.transpose(x_nchw, (0, 2, 3, 1)).astype(jnp.float32)
    mu = x.mean(-1, keepdims=True)
    var = ((x - mu) ** 2).mean(-1, keepdims=True)
    xn = (x - mu) / jnp.sqrt(var + EPS) * params['ln_w'][0] + params['ln_b'][0]
    h = _gelu(jnp.einsum('nhwc,cd->nhwd', xn, params['w1']) + params['b1'][0])
    Cmid = h.shape[-1]
    wdw = params['wdw'].reshape(3, 3, 1, Cmid)            # HWIO, grouped
    h = jax.lax.conv_general_dilated(
        h, wdw, window_strides=(1, 1), padding=((1, 1), (1, 1)),
        dimension_numbers=('NHWC', 'HWIO', 'NHWC'),
        feature_group_count=Cmid) + params['bdw'][0]
    h = _gelu(h)
    y = jnp.einsum('nhwc,cd->nhwd', h, params['w3']) + params['b3'][0]
    sc = jnp.einsum('nhwc,cd->nhwd', x, params['ws']) + params['bs'][0]
    return jnp.transpose(y + sc, (0, 3, 1, 2))


if __name__ == "__main__":
    N, Cin, H, W = 2, 4, 16, 16
    Cout = 8
    Cmid = make_divisible(Cout * 4.0)                     # = 32

    key = jax.random.PRNGKey(0)
    ks = jax.random.split(key, 12)
    s = 0.2
    params = {
        'ln_w': 1.0 + s * jax.random.normal(ks[0], (1, Cin), jnp.float32),
        'ln_b': s * jax.random.normal(ks[1], (1, Cin), jnp.float32),
        'w1':   s * jax.random.normal(ks[2], (Cin, Cmid), jnp.float32),
        'b1':   s * jax.random.normal(ks[3], (1, Cmid), jnp.float32),
        'wdw':  s * jax.random.normal(ks[4], (9, Cmid), jnp.float32),
        'bdw':  s * jax.random.normal(ks[5], (1, Cmid), jnp.float32),
        'w3':   s * jax.random.normal(ks[6], (Cmid, Cout), jnp.float32),
        'b3':   s * jax.random.normal(ks[7], (1, Cout), jnp.float32),
        'ws':   s * jax.random.normal(ks[8], (Cin, Cout), jnp.float32),
        'bs':   s * jax.random.normal(ks[9], (1, Cout), jnp.float32),
    }
    x = jax.random.normal(ks[10], (N, Cin, H, W), jnp.float32)

    ref = jax.block_until_ready(reference(x, params))

    # f32 MXU operands + forced 2 row-blocks (exercises halo exchange + pl.when
    # boundary zeroing): tight structural check against the pure-JAX reference.
    out_f32 = jax.block_until_ready(
        mbconv_ln_block(x, params, mxu_dtype=jnp.float32, tile_h=8))
    assert out_f32.shape == (N, Cout, H, W), out_f32.shape
    assert jnp.allclose(out_f32, ref, atol=5e-3, rtol=5e-3), \
        f"f32 max abs diff {float(jnp.max(jnp.abs(out_f32 - ref)))}"

    # Production config: bf16 MXU operands + bf16 HBM activations, auto row tile.
    out_bf16 = jax.block_until_ready(mbconv_ln_block(x, params))
    assert out_bf16.shape == (N, Cout, H, W), out_bf16.shape
    assert jnp.allclose(out_bf16, ref, atol=5e-2, rtol=5e-2), \
        f"bf16 max abs diff {float(jnp.max(jnp.abs(out_bf16 - ref)))}"

    print("KERNEL_OK")
</pallas_src>

<mosaic_0001>
module attributes {stable_mosaic.version = 11 : i64} {
  func.func @mbconv_ln_kernel(%arg0: i32, %arg1: i32, %arg2: memref<1x8x16x128xf32, #tpu.memory_space<vmem>>, %arg3: memref<1x2x16x128xf32, #tpu.memory_space<vmem>>, %arg4: memref<128x128xf32, #tpu.memory_space<vmem>>, %arg5: memref<1x128xf32, #tpu.memory_space<vmem>>, %arg6: memref<9x128xf32, #tpu.memory_space<vmem>>, %arg7: memref<1x128xf32, #tpu.memory_space<vmem>>, %arg8: memref<128x128xf32, #tpu.memory_space<vmem>>, %arg9: memref<128x128xf32, #tpu.memory_space<vmem>>, %arg10: memref<1x128xf32, #tpu.memory_space<vmem>>, %arg11: memref<1x8x16x128xf32, #tpu.memory_space<vmem>>, %arg12: memref<10x32x128xf32, #tpu.memory_space<vmem>>) attributes {dimension_semantics = [#tpu.dimension_semantics<parallel>, #tpu.dimension_semantics<parallel>], iteration_bounds = array<i64: 2, 2>, scalar_prefetch = 0 : i64, scratch_operands = 1 : i64, tpu.core_type = #tpu.core_type<tc>, window_params = [{transform_indices = @transform_0, window_bounds = array<i64: 1, 8, 16, 128>}, {transform_indices = @transform_1, window_bounds = array<i64: 1, 2, 16, 128>}, {pipeline_mode = #tpu.pipeline_mode<synchronous>, transform_indices = @transform_2, window_bounds = array<i64: 128, 128>}, {pipeline_mode = #tpu.pipeline_mode<synchronous>, transform_indices = @transform_3, window_bounds = array<i64: 1, 128>}, {pipeline_mode = #tpu.pipeline_mode<synchronous>, transform_indices = @transform_4, window_bounds = array<i64: 9, 128>}, {pipeline_mode = #tpu.pipeline_mode<synchronous>, transform_indices = @transform_5, window_bounds = array<i64: 1, 128>}, {pipeline_mode = #tpu.pipeline_mode<synchronous>, transform_indices = @transform_6, window_bounds = array<i64: 128, 128>}, {pipeline_mode = #tpu.pipeline_mode<synchronous>, transform_indices = @transform_7, window_bounds = array<i64: 128, 128>}, {pipeline_mode = #tpu.pipeline_mode<synchronous>, transform_indices = @transform_8, window_bounds = array<i64: 1, 128>}, {transform_indices = @transform_9, window_bounds = array<i64: 1, 8, 16, 128>}]} {
    %0 = tpu.iota {dimensions = array<i32: 1>} : vector<1x128xi32>
    %c4_i32 = arith.constant 4 : i32
    %1 = vector.broadcast %c4_i32 : i32 to vector<1x128xi32>
    %2 = arith.cmpi slt, %0, %1 : vector<1x128xi32>
    %3 = arith.extui %2 : vector<1x128xi1> to vector<1x128xi32>
    %4 = arith.sitofp %3 : vector<1x128xi32> to vector<1x128xf32>
    %c0 = arith.constant 0 : index
    %c0_0 = arith.constant 0 : index
    %c0_1 = arith.constant 0 : index
    %c0_2 = arith.constant 0 : index
    %5 = vector.load %arg2[%c0, %c0_0, %c0_1, %c0_2] : memref<1x8x16x128xf32, #tpu.memory_space<vmem>>, vector<1x8x16x128xf32>
    %6 = vector.shape_cast %5 : vector<1x8x16x128xf32> to vector<8x16x128xf32>
    %7 = vector.shape_cast %6 : vector<8x16x128xf32> to vector<128x128xf32>
    %c0_3 = arith.constant 0 : index
    %c0_4 = arith.constant 0 : index
    %8 = vector.load %arg9[%c0_3, %c0_4] : memref<128x128xf32, #tpu.memory_space<vmem>>, vector<128x128xf32>
    %cst = arith.constant dense<0.000000e+00> : vector<128x128xf32>
    %9 = tpu.matmul %7, %8, %cst {dimension_numbers = #tpu.dot_dimension_numbers<[1], [0], [0], [1], [0, 0, 1, 1], [], []>} : vector<128x128xf32>, vector<128x128xf32>, vector<128x128xf32> -> vector<128x128xf32>
    %cst_5 = arith.constant dense<0.000000e+00> : vector<128xf32>
    %10 = vector.multi_reduction <add>, %7, %cst_5 [1] : vector<128x128xf32> to vector<128xf32>
    %11 = vector.shape_cast %10 : vector<128xf32> to vector<128x1xf32>
    %cst_6 = arith.constant 2.500000e-01 : f32
    %12 = vector.broadcast %cst_6 : f32 to vector<128x1xf32>
    %13 = arith.mulf %11, %12 : vector<128x1xf32>
    %14 = vector.broadcast %13 : vector<128x1xf32> to vector<128x128xf32>
    %15 = arith.subf %7, %14 : vector<128x128xf32>
    %16 = vector.broadcast %4 : vector<1x128xf32> to vector<128x128xf32>
    %17 = arith.mulf %15, %16 : vector<128x128xf32>
    %18 = arith.mulf %17, %17 : vector<128x128xf32>
    %cst_7 = arith.constant dense<0.000000e+00> : vector<128xf32>
    %19 = vector.multi_reduction <add>, %18, %cst_7 [1] : vector<128x128xf32> to vector<128xf32>
    %20 = vector.shape_cast %19 : vector<128xf32> to vector<128x1xf32>
    %cst_8 = arith.constant 2.500000e-01 : f32
    %21 = vector.broadcast %cst_8 : f32 to vector<128x1xf32>
    %22 = arith.mulf %20, %21 : vector<128x1xf32>
    %cst_9 = arith.constant 9.99999997E-7 : f32
    %23 = vector.broadcast %cst_9 : f32 to vector<128x1xf32>
    %24 = arith.addf %22, %23 : vector<128x1xf32>
    %25 = math.rsqrt %24 : vector<128x1xf32>
    %26 = vector.broadcast %25 : vector<128x1xf32> to vector<128x128xf32>
    %27 = arith.mulf %17, %26 : vector<128x128xf32>
    %c0_10 = arith.constant 0 : index
    %c0_11 = arith.constant 0 : index
    %28 = vector.load %arg4[%c0_10, %c0_11] : memref<128x128xf32, #tpu.memory_space<vmem>>, vector<128x128xf32>
    %cst_12 = arith.constant dense<0.000000e+00> : vector<128x128xf32>
    %29 = tpu.matmul %27, %28, %cst_12 {dimension_numbers = #tpu.dot_dimension_numbers<[1], [0], [0], [1], [0, 0, 1, 1], [], []>} : vector<128x128xf32>, vector<128x128xf32>, vector<128x128xf32> -> vector<128x128xf32>
    %c0_13 = arith.constant 0 : index
    %c0_14 = arith.constant 0 : index
    %30 = vector.load %arg5[%c0_13, %c0_14] : memref<1x128xf32, #tpu.memory_space<vmem>>, vector<1x128xf32>
    %31 = vector.broadcast %30 : vector<1x128xf32> to vector<128x128xf32>
    %32 = arith.addf %29, %31 : vector<128x128xf32>
    %cst_15 = arith.constant 5.000000e-01 : f32
    %33 = vector.broadcast %cst_15 : f32 to vector<128x128xf32>
    %34 = arith.mulf %33, %32 : vector<128x128xf32>
    %cst_16 = arith.constant 0.707106769 : f32
    %35 = vector.broadcast %cst_16 : f32 to vector<128x128xf32>
    %36 = arith.mulf %32, %35 : vector<128x128xf32>
    %37 = math.erf %36 : vector<128x128xf32>
    %cst_17 = arith.constant 1.000000e+00 : f32
    %38 = vector.broadcast %cst_17 : f32 to vector<128x128xf32>
    %39 = arith.addf %38, %37 : vector<128x128xf32>
    %40 = arith.mulf %34, %39 : vector<128x128xf32>
    %41 = vector.shape_cast %40 : vector<128x128xf32> to vector<8x16x128xf32>
    %c0_18 = arith.constant 0 : index
    %c0_19 = arith.constant 0 : index
    %c0_20 = arith.constant 0 : index
    %c0_21 = arith.constant 0 : index
    %42 = vector.load %arg3[%c0_18, %c0_19, %c0_20, %c0_21] : memref<1x2x16x128xf32, #tpu.memory_space<vmem>>, vector<1x2x16x128xf32>
    %43 = vector.shape_cast %42 : vector<1x2x16x128xf32> to vector<2x16x128xf32>
    %44 = vector.shape_cast %43 : vector<2x16x128xf32> to vector<32x128xf32>
    %cst_22 = arith.constant dense<0.000000e+00> : vector<32xf32>
    %45 = vector.multi_reduction <add>, %44, %cst_22 [1] : vector<32x128xf32> to vector<32xf32>
    %46 = vector.shape_cast %45 : vector<32xf32> to vector<32x1xf32>
    %cst_23 = arith.constant 2.500000e-01 : f32
    %47 = vector.broadcast %cst_23 : f32 to vector<32x1xf32>
    %48 = arith.mulf %46, %47 : vector<32x1xf32>
    %49 = vector.broadcast %48 : vector<32x1xf32> to vector<32x128xf32>
    %50 = arith.subf %44, %49 : vector<32x128xf32>
    %51 = vector.broadcast %4 : vector<1x128xf32> to vector<32x128xf32>
    %52 = arith.mulf %50, %51 : vector<32x128xf32>
    %53 = arith.mulf %52, %52 : vector<32x128xf32>
    %cst_24 = arith.constant dense<0.000000e+00> : vector<32xf32>
    %54 = vector.multi_reduction <add>, %53, %cst_24 [1] : vector<32x128xf32> to vector<32xf32>
    %55 = vector.shape_cast %54 : vector<32xf32> to vector<32x1xf32>
    %cst_25 = arith.constant 2.500000e-01 : f32
    %56 = vector.broadcast %cst_25 : f32 to vector<32x1xf32>
    %57 = arith.mulf %55, %56 : vector<32x1xf32>
    %cst_26 = arith.constant 9.99999997E-7 : f32
    %58 = vector.broadcast %cst_26 : f32 to vector<32x1xf32>
    %59 = arith.addf %57, %58 : vector<32x1xf32>
    %60 = math.rsqrt %59 : vector<32x1xf32>
    %61 = vector.broadcast %60 : vector<32x1xf32> to vector<32x128xf32>
    %62 = arith.mulf %52, %61 : vector<32x128xf32>
    %c0_27 = arith.constant 0 : index
    %c0_28 = arith.constant 0 : index
    %63 = vector.load %arg4[%c0_27, %c0_28] : memref<128x128xf32, #tpu.memory_space<vmem>>, vector<128x128xf32>
    %cst_29 = arith.constant dense<0.000000e+00> : vector<32x128xf32>
    %64 = tpu.matmul %62, %63, %cst_29 {dimension_numbers = #tpu.dot_dimension_numbers<[1], [0], [0], [1], [0, 0, 1, 1], [], []>} : vector<32x128xf32>, vector<128x128xf32>, vector<32x128xf32> -> vector<32x128xf32>
    %c0_30 = arith.constant 0 : index
    %c0_31 = arith.constant 0 : index
    %65 = vector.load %arg5[%c0_30, %c0_31] : memref<1x128xf32, #tpu.memory_space<vmem>>, vector<1x128xf32>
    %66 = vector.broadcast %65 : vector<1x128xf32> to vector<32x128xf32>
    %67 = arith.addf %64, %66 : vector<32x128xf32>
    %cst_32 = arith.constant 5.000000e-01 : f32
    %68 = vector.broadcast %cst_32 : f32 to vector<32x128xf32>
    %69 = arith.mulf %68, %67 : vector<32x128xf32>
    %cst_33 = arith.constant 0.707106769 : f32
    %70 = vector.broadcast %cst_33 : f32 to vector<32x128xf32>
    %71 = arith.mulf %67, %70 : vector<32x128xf32>
    %72 = math.erf %71 : vector<32x128xf32>
    %cst_34 = arith.constant 1.000000e+00 : f32
    %73 = vector.broadcast %cst_34 : f32 to vector<32x128xf32>
    %74 = arith.addf %73, %72 : vector<32x128xf32>
    %75 = arith.mulf %69, %74 : vector<32x128xf32>
    %76 = vector.shape_cast %75 : vector<32x128xf32> to vector<2x16x128xf32>
    %cst_35 = arith.constant 0.000000e+00 : f32
    %77 = vector.broadcast %cst_35 : f32 to vector<10x1x128xf32>
    %c0_36 = arith.constant 0 : index
    %c7 = arith.constant 7 : index
    %c0_37 = arith.constant 0 : index
    %78 = vector.load %arg12[%c0_36, %c7, %c0_37] : memref<10x32x128xf32, #tpu.memory_space<vmem>>, vector<10x1x128xf32>
    tpu.vector_store %arg12[%c0_36, %c7, %c0_37], %77 {strides = array<i32>} : memref<10x32x128xf32, #tpu.memory_space<vmem>>, vector<10x1x128xf32>,
    %c0_38 = arith.constant 0 : index
    %c24 = arith.constant 24 : index
    %c0_39 = arith.constant 0 : index
    %79 = vector.load %arg12[%c0_38, %c24, %c0_39] : memref<10x32x128xf32, #tpu.memory_space<vmem>>, vector<10x1x128xf32>
    tpu.vector_store %arg12[%c0_38, %c24, %c0_39], %77 {strides = array<i32>} : memref<10x32x128xf32, #tpu.memory_space<vmem>>, vector<10x1x128xf32>,
    %c1 = arith.constant 1 : index
    %c8 = arith.constant 8 : index
    %c0_40 = arith.constant 0 : index
    %80 = vector.load %arg12[%c1, %c8, %c0_40] : memref<10x32x128xf32, #tpu.memory_space<vmem>>, vector<8x16x128xf32>
    tpu.vector_store %arg12[%c1, %c8, %c0_40], %41 {strides = array<i32>} : memref<10x32x128xf32, #tpu.memory_space<vmem>>, vector<8x16x128xf32>,
    %81 = vector.extract_strided_slice %76 {offsets = [0, 0, 0], sizes = [1, 16, 128], strides = [1, 1, 1]} : vector<2x16x128xf32> to vector<1x16x128xf32>
    %c0_41 = arith.constant 0 : index
    %c8_42 = arith.constant 8 : index
    %c0_43 = arith.constant 0 : index
    %82 = vector.load %arg12[%c0_41, %c8_42, %c0_43] : memref<10x32x128xf32, #tpu.memory_space<vmem>>, vector<1x16x128xf32>
    tpu.vector_store %arg12[%c0_41, %c8_42, %c0_43], %81 {strides = array<i32>} : memref<10x32x128xf32, #tpu.memory_space<vmem>>, vector<1x16x128xf32>,
    %83 = vector.extract_strided_slice %76 {offsets = [1, 0, 0], sizes = [1, 16, 128], strides = [1, 1, 1]} : vector<2x16x128xf32> to vector<1x16x128xf32>
    %c9 = arith.constant 9 : index
    %c8_44 = arith.constant 8 : index
    %c0_45 = arith.constant 0 : index
    %84 = vector.load %arg12[%c9, %c8_44, %c0_45] : memref<10x32x128xf32, #tpu.memory_space<vmem>>, vector<1x16x128xf32>
    tpu.vector_store %arg12[%c9, %c8_44, %c0_45], %83 {strides = array<i32>} : memref<10x32x128xf32, #tpu.memory_space<vmem>>, vector<1x16x128xf32>,
    %cst_46 = arith.constant 0.000000e+00 : f32
    %85 = vector.broadcast %cst_46 : f32 to vector<1x16x128xf32>
    %c0_i32 = arith.constant 0 : i32
    %86 = arith.cmpi eq, %arg1, %c0_i32 : i32
    %87 = arith.extui %86 : i1 to i32
    %c0_i32_47 = arith.constant 0 : i32
    %88 = arith.cmpi ne, %87, %c0_i32_47 : i32
    scf.if %88 {
      %c0_100 = arith.constant 0 : index
      %c8_101 = arith.constant 8 : index
      %c0_102 = arith.constant 0 : index
      %177 = vector.load %arg12[%c0_100, %c8_101, %c0_102] : memref<10x32x128xf32, #tpu.memory_space<vmem>>, vector<1x16x128xf32>
      tpu.vector_store %arg12[%c0_100, %c8_101, %c0_102], %85 {strides = array<i32>} : memref<10x32x128xf32, #tpu.memory_space<vmem>>, vector<1x16x128xf32>,
    } else {
    }
    %c1_i32 = arith.constant 1 : i32
    %89 = arith.cmpi eq, %arg1, %c1_i32 : i32
    %90 = arith.extui %89 : i1 to i32
    %c0_i32_48 = arith.constant 0 : i32
    %91 = arith.cmpi ne, %90, %c0_i32_48 : i32
    scf.if %91 {
      %c9_100 = arith.constant 9 : index
      %c8_101 = arith.constant 8 : index
      %c0_102 = arith.constant 0 : index
      %177 = vector.load %arg12[%c9_100, %c8_101, %c0_102] : memref<10x32x128xf32, #tpu.memory_space<vmem>>, vector<1x16x128xf32>
      tpu.vector_store %arg12[%c9_100, %c8_101, %c0_102], %85 {strides = array<i32>} : memref<10x32x128xf32, #tpu.memory_space<vmem>>, vector<1x16x128xf32>,
    } else {
    }
    %c4 = arith.constant 4 : index
    %c0_49 = arith.constant 0 : index
    %92 = vector.load %arg6[%c4, %c0_49] : memref<9x128xf32, #tpu.memory_space<vmem>>, vector<1x128xf32>
    %93 = vector.shape_cast %92 : vector<1x128xf32> to vector<128xf32>
    %94 = vector.shape_cast %93 : vector<128xf32> to vector<1x1x128xf32>
    %95 = vector.broadcast %94 : vector<1x1x128xf32> to vector<8x16x128xf32>
    %96 = arith.mulf %41, %95 : vector<8x16x128xf32>
    %c0_50 = arith.constant 0 : index
    %c0_51 = arith.constant 0 : index
    %97 = vector.load %arg7[%c0_50, %c0_51] : memref<1x128xf32, #tpu.memory_space<vmem>>, vector<1x128xf32>
    %98 = vector.shape_cast %97 : vector<1x128xf32> to vector<128xf32>
    %99 = vector.shape_cast %98 : vector<128xf32> to vector<1x1x128xf32>
    %100 = vector.broadcast %99 : vector<1x1x128xf32> to vector<8x16x128xf32>
    %101 = arith.addf %96, %100 : vector<8x16x128xf32>
    %c0_52 = arith.constant 0 : index
    %c7_53 = arith.constant 7 : index
    %c0_54 = arith.constant 0 : index
    %102 = vector.load %arg12[%c0_52, %c7_53, %c0_54] : memref<10x32x128xf32, #tpu.memory_space<vmem>>, vector<8x16x128xf32>
    %c0_55 = arith.constant 0 : index
    %c0_56 = arith.constant 0 : index
    %103 = vector.load %arg6[%c0_55, %c0_56] : memref<9x128xf32, #tpu.memory_space<vmem>>, vector<1x128xf32>
    %104 = vector.shape_cast %103 : vector<1x128xf32> to vector<128xf32>
    %105 = vector.shape_cast %104 : vector<128xf32> to vector<1x1x128xf32>
    %106 = vector.broadcast %105 : vector<1x1x128xf32> to vector<8x16x128xf32>
    %107 = arith.mulf %102, %106 : vector<8x16x128xf32>
    %108 = arith.addf %101, %107 : vector<8x16x128xf32>
    %c0_57 = arith.constant 0 : index
    %c8_58 = arith.constant 8 : index
    %c0_59 = arith.constant 0 : index
    %109 = vector.load %arg12[%c0_57, %c8_58, %c0_59] : memref<10x32x128xf32, #tpu.memory_space<vmem>>, vector<8x16x128xf32>
    %c1_60 = arith.constant 1 : index
    %c0_61 = arith.constant 0 : index
    %110 = vector.load %arg6[%c1_60, %c0_61] : memref<9x128xf32, #tpu.memory_space<vmem>>, vector<1x128xf32>
    %111 = vector.shape_cast %110 : vector<1x128xf32> to vector<128xf32>
    %112 = vector.shape_cast %111 : vector<128xf32> to vector<1x1x128xf32>
    %113 = vector.broadcast %112 : vector<1x1x128xf32> to vector<8x16x128xf32>
    %114 = arith.mulf %109, %113 : vector<8x16x128xf32>
    %115 = arith.addf %108, %114 : vector<8x16x128xf32>
    %c0_62 = arith.constant 0 : index
    %c9_63 = arith.constant 9 : index
    %c0_64 = arith.constant 0 : index
    %116 = vector.load %arg12[%c0_62, %c9_63, %c0_64] : memref<10x32x128xf32, #tpu.memory_space<vmem>>, vector<8x16x128xf32>
    %c2 = arith.constant 2 : index
    %c0_65 = arith.constant 0 : index
    %117 = vector.load %arg6[%c2, %c0_65] : memref<9x128xf32, #tpu.memory_space<vmem>>, vector<1x128xf32>
    %118 = vector.shape_cast %117 : vector<1x128xf32> to vector<128xf32>
    %119 = vector.shape_cast %118 : vector<128xf32> to vector<1x1x128xf32>
    %120 = vector.broadcast %119 : vector<1x1x128xf32> to vector<8x16x128xf32>
    %121 = arith.mulf %116, %120 : vector<8x16x128xf32>
    %122 = arith.addf %115, %121 : vector<8x16x128xf32>
    %c1_66 = arith.constant 1 : index
    %c7_67 = arith.constant 7 : index
    %c0_68 = arith.constant 0 : index
    %123 = vector.load %arg12[%c1_66, %c7_67, %c0_68] : memref<10x32x128xf32, #tpu.memory_space<vmem>>, vector<8x16x128xf32>
    %c3 = arith.constant 3 : index
    %c0_69 = arith.constant 0 : index
    %124 = vector.load %arg6[%c3, %c0_69] : memref<9x128xf32, #tpu.memory_space<vmem>>, vector<1x128xf32>
    %125 = vector.shape_cast %124 : vector<1x128xf32> to vector<128xf32>
    %126 = vector.shape_cast %125 : vector<128xf32> to vector<1x1x128xf32>
    %127 = vector.broadcast %126 : vector<1x1x128xf32> to vector<8x16x128xf32>
    %128 = arith.mulf %123, %127 : vector<8x16x128xf32>
    %129 = arith.addf %122, %128 : vector<8x16x128xf32>
    %c1_70 = arith.constant 1 : index
    %c9_71 = arith.constant 9 : index
    %c0_72 = arith.constant 0 : index
    %130 = vector.load %arg12[%c1_70, %c9_71, %c0_72] : memref<10x32x128xf32, #tpu.memory_space<vmem>>, vector<8x16x128xf32>
    %c5 = arith.constant 5 : index
    %c0_73 = arith.constant 0 : index
    %131 = vector.load %arg6[%c5, %c0_73] : memref<9x128xf32, #tpu.memory_space<vmem>>, vector<1x128xf32>
    %132 = vector.shape_cast %131 : vector<1x128xf32> to vector<128xf32>
    %133 = vector.shape_cast %132 : vector<128xf32> to vector<1x1x128xf32>
    %134 = vector.broadcast %133 : vector<1x1x128xf32> to vector<8x16x128xf32>
    %135 = arith.mulf %130, %134 : vector<8x16x128xf32>
    %136 = arith.addf %129, %135 : vector<8x16x128xf32>
    %c2_74 = arith.constant 2 : index
    %c7_75 = arith.constant 7 : index
    %c0_76 = arith.constant 0 : index
    %137 = vector.load %arg12[%c2_74, %c7_75, %c0_76] : memref<10x32x128xf32, #tpu.memory_space<vmem>>, vector<8x16x128xf32>
    %c6 = arith.constant 6 : index
    %c0_77 = arith.constant 0 : index
    %138 = vector.load %arg6[%c6, %c0_77] : memref<9x128xf32, #tpu.memory_space<vmem>>, vector<1x128xf32>
    %139 = vector.shape_cast %138 : vector<1x128xf32> to vector<128xf32>
    %140 = vector.shape_cast %139 : vector<128xf32> to vector<1x1x128xf32>
    %141 = vector.broadcast %140 : vector<1x1x128xf32> to vector<8x16x128xf32>
    %142 = arith.mulf %137, %141 : vector<8x16x128xf32>
    %143 = arith.addf %136, %142 : vector<8x16x128xf32>
    %c2_78 = arith.constant 2 : index
    %c8_79 = arith.constant 8 : index
    %c0_80 = arith.constant 0 : index
    %144 = vector.load %arg12[%c2_78, %c8_79, %c0_80] : memref<10x32x128xf32, #tpu.memory_space<vmem>>, vector<8x16x128xf32>
    %c7_81 = arith.constant 7 : index
    %c0_82 = arith.constant 0 : index
    %145 = vector.load %arg6[%c7_81, %c0_82] : memref<9x128xf32, #tpu.memory_space<vmem>>, vector<1x128xf32>
    %146 = vector.shape_cast %145 : vector<1x128xf32> to vector<128xf32>
    %147 = vector.shape_cast %146 : vector<128xf32> to vector<1x1x128xf32>
    %148 = vector.broadcast %147 : vector<1x1x128xf32> to vector<8x16x128xf32>
    %149 = arith.mulf %144, %148 : vector<8x16x128xf32>
    %150 = arith.addf %143, %149 : vector<8x16x128xf32>
    %c2_83 = arith.constant 2 : index
    %c9_84 = arith.constant 9 : index
    %c0_85 = arith.constant 0 : index
    %151 = vector.load %arg12[%c2_83, %c9_84, %c0_85] : memref<10x32x128xf32, #tpu.memory_space<vmem>>, vector<8x16x128xf32>
    %c8_86 = arith.constant 8 : index
    %c0_87 = arith.constant 0 : index
    %152 = vector.load %arg6[%c8_86, %c0_87] : memref<9x128xf32, #tpu.memory_space<vmem>>, vector<1x128xf32>
    %153 = vector.shape_cast %152 : vector<1x128xf32> to vector<128xf32>
    %154 = vector.shape_cast %153 : vector<128xf32> to vector<1x1x128xf32>
    %155 = vector.broadcast %154 : vector<1x1x128xf32> to vector<8x16x128xf32>
    %156 = arith.mulf %151, %155 : vector<8x16x128xf32>
    %157 = arith.addf %150, %156 : vector<8x16x128xf32>
    %cst_88 = arith.constant 5.000000e-01 : f32
    %158 = vector.broadcast %cst_88 : f32 to vector<8x16x128xf32>
    %159 = arith.mulf %158, %157 : vector<8x16x128xf32>
    %cst_89 = arith.constant 0.707106769 : f32
    %160 = vector.broadcast %cst_89 : f32 to vector<8x16x128xf32>
    %161 = arith.mulf %157, %160 : vector<8x16x128xf32>
    %162 = math.erf %161 : vector<8x16x128xf32>
    %cst_90 = arith.constant 1.000000e+00 : f32
    %163 = vector.broadcast %cst_90 : f32 to vector<8x16x128xf32>
    %164 = arith.addf %163, %162 : vector<8x16x128xf32>
    %165 = arith.mulf %159, %164 : vector<8x16x128xf32>
    %166 = vector.shape_cast %165 : vector<8x16x128xf32> to vector<128x128xf32>
    %c0_91 = arith.constant 0 : index
    %c0_92 = arith.constant 0 : index
    %167 = vector.load %arg8[%c0_91, %c0_92] : memref<128x128xf32, #tpu.memory_space<vmem>>, vector<128x128xf32>
    %cst_93 = arith.constant dense<0.000000e+00> : vector<128x128xf32>
    %168 = tpu.matmul %166, %167, %cst_93 {dimension_numbers = #tpu.dot_dimension_numbers<[1], [0], [0], [1], [0, 0, 1, 1], [], []>} : vector<128x128xf32>, vector<128x128xf32>, vector<128x128xf32> -> vector<128x128xf32>
    %169 = arith.addf %168, %9 : vector<128x128xf32>
    %c0_94 = arith.constant 0 : index
    %c0_95 = arith.constant 0 : index
    %170 = vector.load %arg10[%c0_94, %c0_95] : memref<1x128xf32, #tpu.memory_space<vmem>>, vector<1x128xf32>
    %171 = vector.broadcast %170 : vector<1x128xf32> to vector<128x128xf32>
    %172 = arith.addf %169, %171 : vector<128x128xf32>
    %173 = vector.shape_cast %172 : vector<128x128xf32> to vector<8x16x128xf32>
    %c0_96 = arith.constant 0 : index
    %c0_97 = arith.constant 0 : index
    %c0_98 = arith.constant 0 : index
    %c0_99 = arith.constant 0 : index
    %174 = vector.load %arg11[%c0_96, %c0_97, %c0_98, %c0_99] : memref<1x8x16x128xf32, #tpu.memory_space<vmem>>, vector<1x8x16x128xf32>
    %175 = vector.shape_cast %174 : vector<1x8x16x128xf32> to vector<8x16x128xf32>
    %176 = vector.shape_cast %173 : vector<8x16x128xf32> to vector<1x8x16x128xf32>
    tpu.vector_store %arg11[%c0_96, %c0_97, %c0_98, %c0_99], %176 {strides = array<i32>} : memref<1x8x16x128xf32, #tpu.memory_space<vmem>>, vector<1x8x16x128xf32>,
    return
  }
  func.func @transform_0(%arg0: i32, %arg1: i32) -> (i32, i32, i32, i32) {
    %c0_i32 = arith.constant 0 : i32
    %c0_i32_0 = arith.constant 0 : i32
    %c0_i32_1 = arith.constant 0 : i32
    return %arg0, %arg1, %c0_i32, %c0_i32_0 : i32, i32, i32, i32
  }
  func.func @transform_1(%arg0: i32, %arg1: i32) -> (i32, i32, i32, i32) {
    %c2_i32 = arith.constant 2 : i32
    %0 = arith.muli %arg0, %c2_i32 : i32
    %1 = arith.addi %0, %arg1 : i32
    %c0_i32 = arith.constant 0 : i32
    %c0_i32_0 = arith.constant 0 : i32
    %c0_i32_1 = arith.constant 0 : i32
    %c0_i32_2 = arith.constant 0 : i32
    return %1, %c0_i32, %c0_i32_0, %c0_i32_1 : i32, i32, i32, i32
  }
  func.func @transform_2(%arg0: i32, %arg1: i32) -> (i32, i32) {
    %c0_i32 = arith.constant 0 : i32
    %c0_i32_0 = arith.constant 0 : i32
    %c0_i32_1 = arith.constant 0 : i32
    return %c0_i32, %c0_i32_0 : i32, i32
  }
  func.func @transform_3(%arg0: i32, %arg1: i32) -> (i32, i32) {
    %c0_i32 = arith.constant 0 : i32
    %c0_i32_0 = arith.constant 0 : i32
    %c0_i32_1 = arith.constant 0 : i32
    return %c0_i32, %c0_i32_0 : i32, i32
  }
  func.func @transform_4(%arg0: i32, %arg1: i32) -> (i32, i32) {
    %c0_i32 = arith.constant 0 : i32
    %c0_i32_0 = arith.constant 0 : i32
    %c0_i32_1 = arith.constant 0 : i32
    return %c0_i32, %c0_i32_0 : i32, i32
  }
  func.func @transform_5(%arg0: i32, %arg1: i32) -> (i32, i32) {
    %c0_i32 = arith.constant 0 : i32
    %c0_i32_0 = arith.constant 0 : i32
    %c0_i32_1 = arith.constant 0 : i32
    return %c0_i32, %c0_i32_0 : i32, i32
  }
  func.func @transform_6(%arg0: i32, %arg1: i32) -> (i32, i32) {
    %c0_i32 = arith.constant 0 : i32
    %c0_i32_0 = arith.constant 0 : i32
    %c0_i32_1 = arith.constant 0 : i32
    return %c0_i32, %c0_i32_0 : i32, i32
  }
  func.func @transform_7(%arg0: i32, %arg1: i32) -> (i32, i32) {
    %c0_i32 = arith.constant 0 : i32
    %c0_i32_0 = arith.constant 0 : i32
    %c0_i32_1 = arith.constant 0 : i32
    return %c0_i32, %c0_i32_0 : i32, i32
  }
  func.func @transform_8(%arg0: i32, %arg1: i32) -> (i32, i32) {
    %c0_i32 = arith.constant 0 : i32
    %c0_i32_0 = arith.constant 0 : i32
    %c0_i32_1 = arith.constant 0 : i32
    return %c0_i32, %c0_i32_0 : i32, i32
  }
  func.func @transform_9(%arg0: i32, %arg1: i32) -> (i32, i32, i32, i32) {
    %c0_i32 = arith.constant 0 : i32
    %c0_i32_0 = arith.constant 0 : i32
    %c0_i32_1 = arith.constant 0 : i32
    return %arg0, %arg1, %c0_i32, %c0_i32_0 : i32, i32, i32, i32
  }
}

</mosaic_0001>

<bundles_post_ra>
// kernel: tpu_custom_call.1
= control target key start
LH: loop header
LB: loop body
LE: loop exit
PB: predicated region body
PF: predicated region fallthrough
CT: control target
= control target key end

     0   :  { %s4497_s0 = inlined_call_operand.hbm [shape: f32[2,16,16,128], index: 0, kind: input, shape index: {}]   ;;  %s4498_s1 = inlined_call_operand.hbm [shape: f32[4,2,16,128], index: 1, kind: input, shape index: {}]   ;;  %s4499_s2 = inlined_call_operand.hbm [shape: f32[128,128], index: 2, kind: input, shape index: {}]   ;;  %s4500_s3 = inlined_call_operand.vmem [shape: f32[1,128], index: 3, kind: input, shape index: {}]   ;;  %s4501_s4 = inlined_call_operand.hbm [shape: f32[9,128], index: 4, kind: input, shape index: {}]   ;;  %s4502_s5 = inlined_call_operand.vmem [shape: f32[1,128], index: 5, kind: input, shape index: {}]   ;;  %s4503_s6 = inlined_call_operand.hbm [shape: f32[128,128], index: 6, kind: input, shape index: {}]   ;;  %s4504_s7 = inlined_call_operand.hbm [shape: f32[128,128], index: 7, kind: input, shape index: {}]   ;;  %s4505_s8 = inlined_call_operand.vmem [shape: f32[1,128], index: 8, kind: input, shape index: {}]   ;;  %s4506_s9 = inlined_call_operand.hbm [shape: f32[2,16,16,128], index: 9, kind: output, shape index: {}]  }
   0x1   :  { %4528 = sst [smem:[#allocation46_spill]] %s4497_s0 }
   0x2   :  { %4529 = sst [smem:[#allocation47_spill]] %s4499_s2 }
   0x3   :  { %4530 = sst [smem:[#allocation48_spill]] %s4500_s3 }
   0x4   :  { %4531 = sst [smem:[#allocation49_spill]] %s4501_s4 }
   0x5   :  { %4532 = sst [smem:[#allocation50_spill]] %s4502_s5 }
   0x6   :  { %4533 = sst [smem:[#allocation51_spill]] %s4503_s6 }
   0x7   :  { %4534 = sst [smem:[#allocation52_spill]] %s4504_s7 }
   0x8   :  { %4535 = sst [smem:[#allocation53_spill]] %s4505_s8 }
   0x9   :  { %4536 = sst [smem:[#allocation54_spill]] %s4506_s9 }
   0xa   :  { %14 = vsyncpa [#allocation4], 0 }
   0xb   :  { %16 = vsyncpa [#allocation4 + $0x1], 0 }
   0xc   :  { %17 = vsyncpa [#allocation7], 0 }
   0xd   :  { %19 = vsyncpa [#allocation7 + $0x1], 0 }
   0xe   :  { %20 = vsyncpa [#allocation10], 0 }
   0xf   :  { %21 = vsyncpa [#allocation13], 0 }
  0x10   :  { %22 = vsyncpa [#allocation5], 0 }
  0x11   :  { %24 = vsyncpa [#allocation5 + $0x1], 0  ;;  %s3233_s30 = smov 0   ;;  %s3235_s10 = smov 0  }
  0x12   :  { %s3237_s11 = smov 0   ;;  %s3239_s12 = smov 0  }
  0x13   :  { %s3241_s13 = smov 0   ;;  %s3243_s14 = smov 0  }
  0x14   :  { %s3245_s15 = smov 0   ;;  %s3247_s16 = smov 0  }
  0x15   :  { %s3249_s17 = smov 0   ;;  %s3251_s18 = smov 0  }
  0x16   :  { %s3253_s19 = smov 0  }
  0x17 LB: > { %4537 = sst [smem:[#allocation21_spill]] %s3131_s10  ;;  %s3287_s20 = sadd.s32 4294967295, %s3167_s19   ;;  %s3167_s19 = sphi %s3253_s19, %s30_s19   ;;  %s3163_s18 = sphi %s3251_s18, %s4630_s18   ;;  %s3159_s17 = sphi %s3249_s17, %s4629_s17   ;;  %s3155_s16 = sphi %s3247_s16, %s4628_s16   ;;  %s3151_s15 = sphi %s3245_s15, %s4627_s15   ;;  %s3147_s14 = sphi %s3243_s14, %s4626_s14   ;;  %s3143_s13 = sphi %s3241_s13, %s4625_s13   ;;  %s3139_s12 = sphi %s3239_s12, %s4621_s12   ;;  %s3135_s11 = sphi %s3237_s11, %s4624_s11   ;;  %s3131_s10 = sphi %s3235_s10, %s4623_s10   ;;  %s3127_s30 = sphi %s3233_s30, %s4620_s30  }
  0x18   : > { %4538 = sst [smem:[#allocation22_spill]] %s3139_s12  ;;  %p94_p0 = scmp.ne.s32.totalorder %s3131_s10, %s3127_s30 }
  0x19   : > { %4539 = sst [smem:[#allocation23_spill]] %s3143_s13  ;;  %p4516_p1 = scmp.eq.s32.totalorder %s3287_s20, 0 }
  0x1a   : > { %4540 = sst [smem:[#allocation24_spill]] %s3151_s15  ;;  %p267_p2 = scmp.eq.s32.totalorder %s3287_s20, 3 }
  0x1b   : > { %4541 = sst [smem:[#allocation25_spill]] %s3155_s16  ;;  %p2234_p3 = scmp.ge.s32.totalorder %s3167_s19, 1 }
  0x1c   : > { %4542 = sst [smem:[#allocation26_spill]] %s3159_s17  ;;  %p280_p4 = scmp.lt.s32.totalorder %s3167_s19, 5 }
  0x1d   : > { %4543 = sst [smem:[#allocation27_spill]] %s3287_s20  ;;  %p3296_p5 = por %p94_p0, %p4516_p1 }
  0x1e   : > { %p3300_p6 = pnand %p2234_p3, %p280_p4  ;;  %s3169_s23 = smov [#allocation8]  }
  0x1f   : > { %s4544_s21 = scalar_select %p3296_p5, 1, 0 }
  0x20   : > { %s292_s24 = sshll.u32 %s3169_s23, 4  ;;  %p2626_p7 = pneg %p3300_p6  ;;  %s293_s24 = int_to_ptr.vmem [resolvable:$true] %s292_s24 }
  0x21   : > { %4545 = sst [smem:[#allocation28_spill]] %s4544_s21  ;;  %s3170_s26 = smov [#allocation9]  }
  0x22   : > { %p3308_p8 = pnand %p2626_p7, %p4516_p1  ;;  %s308_s27 = sshll.u32 %s3170_s26, 4  ;;  %s309_s27 = int_to_ptr.vmem [resolvable:$true] %s308_s27 }
  0x23   : > { %s2882_s28 = scalar_lea.vmem %s293_s24, 2048  ;;  %p2890_p13 = scmp.lt.s32.totalorder %s293_s24, %s293_s24 }
  0x24   : > { %p2873_p9 = pneg %p3308_p8  ;;  %p2883_p10 = scmp.ne.s32.totalorder %s293_s24, %s2882_s28 }
  0x25   : > { %p2891_p0 = scmp.lt.s32.totalorder %s2882_s28, %s2882_s28 }
  0x26   : > { %p2885_p11 = pnand %p2883_p10, %p2873_p9 }
  0x27   : > { %p2892_p3 = por %p2891_p0, %p2890_p13 }
  0x28   : > { %p2886_p12 = pneg %p2885_p11 }
  0x2a   : > { %p2893_p4 = pnand %p2892_p3, %p2886_p12 }
  0x2c   : > { %2896 = shalt.err (!%p2893_p4)
}
  0x2d   : > { %s4508_s29 = smov 128   ;;  %s4510_s30 = smov 8  }
  0x2e   : > { %s4548_s2 = sld [smem:[#allocation47_spill]]  ;;  %s2908_s9 = scalar_lea.vmem %s309_s27, 256 }
  0x2f   : > { %p2909_p7 = scmp.ne.s32.totalorder %s309_s27, %s2908_s9  ;;  %p2916_p12 = scmp.lt.s32.totalorder %s309_s27, %s309_s27 }
  0x30   : > { %p2917_p13 = scmp.lt.s32.totalorder %s2908_s9, %s2908_s9 }
  0x31   : > { %p2911_p10 = pnand %p2909_p7, %p2873_p9 }
  0x32   : > { %p2918_p0 = por %p2917_p13, %p2916_p12 }
  0x33   : > { %p2912_p11 = pneg %p2911_p10 }
  0x34   : > { %2629 = dma.hbm_to_vmem [thread:$0]  (!%p3308_p8), %s4548_s2, 2048, %s293_s24, [#allocation7], %s4508_s29, %s4508_s29, %s4510_s30  }
  0x35   : > { %p2919_p3 = pnand %p2918_p0, %p2912_p11 }
  0x37   : > { %2922 = shalt.err (!%p2919_p3)
}
  0x38   : > { %s4549_s4 = sld [smem:[#allocation49_spill]]  ;;  %s3173_s24 = smov [#allocation11]  }
  0x39   : > { %s324_s23 = sshll.u32 %s3173_s24, 4  ;;  %s3174_s26 = smov [#allocation12]   ;;  %s325_s23 = int_to_ptr.vmem [resolvable:$true] %s324_s23 }
  0x3a   : > { %s337_s2 = sshll.u32 %s3174_s26, 4  ;;  %s2934_s8 = scalar_lea.vmem %s325_s23, 2048  ;;  %s338_s2 = int_to_ptr.vmem [resolvable:$true] %s337_s2 }
  0x3b   : > { %p2935_p4 = scmp.ne.s32.totalorder %s325_s23, %s2934_s8  ;;  %p2942_p11 = scmp.lt.s32.totalorder %s325_s23, %s325_s23 }
  0x3c   : > { %p2943_p12 = scmp.lt.s32.totalorder %s2934_s8, %s2934_s8 }
  0x3d   : > { %p2937_p7 = pnand %p2935_p4, %p2873_p9 }
  0x3e   : > { %2632 = dma.hbm_to_vmem [thread:$0]  (!%p3308_p8), %s4549_s4, 256, %s309_s27, [#allocation10], %s4508_s29, %s4508_s29, %s4510_s30  }
  0x3f   : > { %p2938_p10 = pneg %p2937_p7  ;;  %p2944_p13 = por %p2943_p12, %p2942_p11 }
  0x41   : > { %p2945_p0 = pnand %p2944_p13, %p2938_p10 }
  0x43   : > { %2948 = shalt.err (!%p2945_p0)
}
  0x44   : > { %s4550_s6 = sld [smem:[#allocation51_spill]]  ;;  %s2960_s27 = scalar_lea.vmem %s338_s2, 2048 }
  0x45   : > { %p2961_p3 = scmp.ne.s32.totalorder %s338_s2, %s2960_s27  ;;  %p2968_p11 = scmp.lt.s32.totalorder %s338_s2, %s338_s2 }
  0x46   : > { %p2969_p10 = scmp.lt.s32.totalorder %s2960_s27, %s2960_s27 }
  0x47   : > { %p2963_p4 = pnand %p2961_p3, %p2873_p9 }
  0x48   : > { %p2970_p12 = por %p2969_p10, %p2968_p11 }
  0x49   : > { %p2964_p7 = pneg %p2963_p4 }
  0x4a   : > { %2635 = dma.hbm_to_vmem [thread:$0]  (!%p3308_p8), %s4550_s6, 2048, %s325_s23, [#allocation10], %s4508_s29, %s4508_s29, %s4510_s30  }
  0x4b   : > { %p2971_p13 = pnand %p2970_p12, %p2964_p7 }
  0x4d   : > { %2974 = shalt.err (!%p2971_p13)
}
  0x4e   : > { %s4551_s7 = sld [smem:[#allocation52_spill]]  ;;  %s2231_s25 = sadd.s32 4294967294, %s3167_s19  }
  0x4f   : > { %p58_p9 = scmp.ne.s32.totalorder %s3147_s14, %s3143_s13  ;;  %p4517_p0 = scmp.eq.s32.totalorder %s3167_s19, 0 }
  0x50   : > { %p64_p3 = scmp.ne.s32.totalorder %s3143_s13, %s3139_s12  ;;  %p273_p7 = scmp.eq.s32.totalorder %s2231_s25, 3 }
  0x51   : > { %p3367_p4 = por %p267_p2, %p58_p9  ;;  %p3373_p11 = por %p4517_p0, %p58_p9 }
  0x52   : > { %p3383_p10 = por %p273_p7, %p64_p3  ;;  %p2654_p2 = scmp.lt.s32.totalorder %s3167_s19, 4 }
  0x53   : > { %s4552_s23 = scalar_select %p3367_p4, 1, 0 }
  0x54   : > { %2638 = dma.hbm_to_vmem [thread:$0]  (!%p3308_p8), %s4551_s7, 2048, %s338_s2, [#allocation13], %s4508_s29, %s4508_s29, %s4510_s30  }
  0x55   : > { %4553 = sst [smem:[#allocation29_spill]] %s4552_s23  ;;  %p3379_p8 = por %p4516_p1, %p64_p3 }
  0x56   : > { %s4557_s9 = scalar_select %p3383_p10, 1, 0 }
  0x57   : > { %s4555_s2 = scalar_select %p3379_p8, 1, 0 }
  0x58   : > { %4558 = sst [smem:[#allocation31_spill]] %s4557_s9  ;;  %s354_s16 = sand.u32 1, %s3147_s14  }
  0x59   : > { %4556 = sst [smem:[#allocation30_spill]] %s4555_s2  ;;  %s2279_s27 = sshll.u32 %s3159_s17, 4 }
  0x5a   : > { %s2240_s8 = sshll.u32 %s354_s16, 7  ;;  %s2243_s28 = sshll.u32 %s3163_s18, 5 }
  0x5b   : > { %s365_s25 = sadd.s32 %s2279_s27, %s2243_s28  ;;  %s358_s24 = scalar_lea.vmem [#allocation3], %s2240_s8 }
  0x5c   : > { %s368_s29 = sshll.u32 %s358_s24, 4  ;;  %s2244_s30 = sshll.u32 %s365_s25, 7  ;;  %s369_s29 = int_to_ptr.vmem [resolvable:$true] %s368_s29 }
  0x5d   : > { %s4559_s0 = sld [smem:[#allocation46_spill]]  ;;  %p3398_p12 = pnand %p2654_p2, %p3373_p11 }
  0x5e   : > { %s39_s9 = sadd.s32 1, %s3159_s17  ;;  %s355_s23 = scalar_lea.sflag [#allocation4], %s354_s16 }
  0x5f   : > { %p2977_p13 = pneg %p3398_p12  ;;  %s2988_s27 = scalar_lea.vmem %s369_s29, 2048 }
  0x60   : > { %p2989_p9 = scmp.ne.s32.totalorder %s369_s29, %s2988_s27  ;;  %s3175_s24 = smov [#allocation3]  }
  0x61   : > { %s2993_s8 = sshll.u32 %s3175_s24, 4  ;;  %s2994_s8 = int_to_ptr.vmem [resolvable:$false] %s2993_s8 }
  0x62   : > { %p2991_p3 = pnand %p2989_p9, %p2977_p13  ;;  %s2995_s4 = scalar_lea.vmem %s2994_s8, 4096 }
  0x63   : > { %s367_s7 = scalar_lea.hbm %s4559_s0, %s2244_s30  ;;  %p2996_p1 = scmp.lt.s32.totalorder %s369_s29, %s2994_s8 }
  0x64   : > { %p2992_p7 = pneg %p2991_p3  ;;  %p2997_p0 = scmp.lt.s32.totalorder %s2995_s4, %s2988_s27 }
  0x66   : > { %p2998_p10 = por %p2997_p0, %p2996_p1 }
  0x68   : > { %p2999_p11 = pnand %p2998_p10, %p2992_p7 }
  0x6a   : > { %3002 = shalt.err (!%p2999_p11)
}
  0x6b   : > { %s4561_s6 = smov 8   ;;  %s4562_s30 = smov 128  }
  0x6c   : > { %2642 = dma.hbm_to_vmem [thread:$0]  (!%p3398_p12), %s367_s7, 2048, %s369_s29, %s355_s23, %s4562_s30, %s4562_s30, %s4561_s6  }
  0x6d   : > { %p40_p1 = scmp.ge.s32.totalorder %s39_s9, 2  ;;  %s42_s26 = sadd.s32 1, %s3163_s18 }
  0x6e   : > { %s2232_s16 = sshll.u32 %s3163_s18, 1  ;;  %s81_s12 = sadd.s32 1, %s3135_s11 }
  0x6f   : > { %s4632_s9 = smov (%p40_p1, %s39_s9), 0  ;;  %s4634_s26 = smov (!%p40_p1, %s42_s26), %s3163_s18 }
  0x70   : > { %s47_s28 = ssub.s32 %s3159_s17, %s4632_s9  ;;  %s75_s25 = sadd.s32 %s3159_s17, %s2232_s16 }
  0x71   : > { %p44_p0 = scmp.ge.s32.totalorder %s4634_s26, 2  ;;  %p88_p10 = scmp.ne.s32.totalorder %s3135_s11, %s3131_s10 }
  0x72   : > { %s378_s27 = sand.u32 1, %s3167_s19   ;;  %s380_s24 = sand.u32 1, %s3135_s11  }
  0x73   : > { %s4636_s26 = smov (%p44_p0, %s4634_s26), 0  ;;  %p4563_p12 = scmp.eq.s32.totalorder %s3167_s19, 0 }
  0x74   : > { %s46_s29 = ssub.s32 %s3163_s18, %s4636_s26  ;;  %s2233_s23 = sshll.u32 %s4636_s26, 1 }
  0x75   : > { %p3427_p13 = por %p88_p10, %p4563_p12  ;;  %s48_s8 = sor.u32 %s47_s28, %s46_s29 }
  0x76   : > { %s77_s4 = sadd.s32 %s2233_s23, %s4632_s9  ;;  %p49_p9 = scmp.eq.s32.totalorder %s48_s8, 0 }
  0x77   : > { %s78_s16 = ssub.s32 %s75_s25, %s77_s4  ;;  %s2245_s0 = sshll.u32 %s380_s24, 5 }
  0x78   : > { %p79_p3 = scmp.eq.s32.totalorder %s78_s16, 0  ;;  %s4565_s17 = sadd.s32 1, %s3147_s14 }
  0x79   : > { %s3438_s5 = scalar_select %p49_p9, %s3147_s14, %s4565_s17  }
  0x7a   : > { %s3441_s15 = scalar_select %p79_p3, %s3135_s11, %s81_s12  }
  0x7b   : > { %s2280_s3 = sshll.u32 %s75_s25, 9  ;;  %s382_s2 = scalar_lea.vmem [#allocation6], %s2245_s0 }
  0x7c   : > { %s390_s20 = scalar_lea.hbm %s4498_s1, %s2280_s3  ;;  %s391_s13 = sshll.u32 %s382_s2, 4  ;;  %s392_s13 = int_to_ptr.vmem [resolvable:$true] %s391_s13 }
  0x7d   : > { %p3450_p7 = pnand %p2654_p2, %p3427_p13  ;;  %s379_s24 = scalar_lea.sflag [#allocation7], %s378_s27 }
  0x7e   : > { %s3016_s17 = scalar_lea.vmem %s392_s13, 512  ;;  %s3176_s12 = smov [#allocation6]  }
  0x7f   : > { %p3005_p11 = pneg %p3450_p7  ;;  %p3017_p1 = scmp.ne.s32.totalorder %s392_s13, %s3016_s17 }
  0x80   : > { %s3021_s10 = sshll.u32 %s3176_s12, 4  ;;  %s3022_s10 = int_to_ptr.vmem [resolvable:$false] %s3021_s10 }
  0x81   : > { %p3019_p0 = pnand %p3017_p1, %p3005_p11  ;;  %s3023_s0 = scalar_lea.vmem %s3022_s10, 1024 }
  0x82   : > { %p3024_p12 = scmp.lt.s32.totalorder %s392_s13, %s3022_s10  ;;  %p3025_p9 = scmp.lt.s32.totalorder %s3023_s0, %s3016_s17 }
  0x83   : > { %p3020_p10 = pneg %p3019_p0 }
  0x84   : > { %p3026_p3 = por %p3025_p9, %p3024_p12 }
  0x86   : > { %p3027_p4 = pnand %p3026_p3, %p3020_p10 }
  0x88   : > { %3030 = shalt.err (!%p3027_p4)
}
  0x89   : > { %2645 = dma.hbm_to_vmem [thread:$0]  (!%p3450_p7), %s390_s20, 512, %s392_s13, %s379_s24, %s4562_s30, %s4562_s30, %s4561_s6  }
  0x8a   : > { %403 = sbr.rel (%p3300_p6) target bundleno = 1089 (0x441), region = 56 }
  0x8f   : > { %s4567_s3 = sld [smem:[#allocation23_spill]] }
  0x95   : > { %s3464_s2 = sand.u32 1, %s4567_s3  }
  0x96   : > { %s2250_s25 = sshll.u32 %s3464_s2, 7  ;;  %s406_s27 = scalar_lea.sflag [#allocation4], %s3464_s2 }
  0x97   : > { %s3470_s7 = scalar_lea.vmem [#allocation3], %s2250_s25 }
  0x98   : > { %3102 = dma.done.wait (%p3379_p8), %s406_s27, 2048  }
  0x99   : > { %3104 = vsyncadd (%p3379_p8), %s406_s27, 4294965248  ;;  %s4569_s13 = sld [smem:[#allocation27_spill]] }
  0x9a   : > { %s4570_s20 = sld [smem:[#allocation21_spill]] }
  0x9f   : > { %s414_s6 = sand.u32 1, %s4569_s13  }
  0xa0   : > { %s416_s30 = sand.u32 1, %s4570_s20   ;;  %s415_s23 = scalar_lea.sflag [#allocation7], %s414_s6 }
  0xa1   : > { %s2251_s29 = sshll.u32 %s416_s30, 5 }
  0xa2   : > { %s3478_s8 = scalar_lea.vmem [#allocation6], %s2251_s29 }
  0xa3   : > { %3106 = dma.done.wait (%p3296_p5), %s415_s23, 512  }
  0xa4   : > { %3108 = vsyncadd (%p3296_p5), %s415_s23, 4294966784  ;;  %p4572_p6 = scmp.eq.s32.totalorder %s4569_s13, 0 }
  0xa6   : > { %3110 = dma.done.wait (%p4572_p6), [#allocation7], 2048   ;;  %p4573_p4 = pmov %p4572_p6 }
  0xa8   : > { %3112 = vsyncadd (%p4573_p4), [#allocation7], 4294965248  ;;  %p4574_p8 = pmov %p4573_p4 }
  0xa9   : > { %p4575_p2 = pmov %p4573_p4 }
  0xaa   : > { %3114 = dma.done.wait (%p4574_p8), [#allocation10], 2304  }
  0xab   : > { %3116 = vsyncadd (%p4575_p2), [#allocation10], 4294964992  ;;  %p4576_p13 = pmov %p4575_p2 }
  0xac   : > { %p4577_p7 = pmov %p4575_p2 }
  0xad   : > { %3118 = dma.done.wait (%p4576_p13), [#allocation13], 2048  }
  0xae   : > { %3120 = vsyncadd (%p4577_p7), [#allocation13], 4294965248  ;;  %v3497_v0 = vld [vmem:[%s3470_s7] sm:$0xff]  ;;  %v3500_v1 = vld [vmem:[%s3470_s7 + $0x10] sm:$0xff]  ;;  %v3177_v10 = vmov 0.0   ;;  %v478_v32 = vlaneseq  ;;  %s4592_s28 = sld [smem:[#allocation48_spill]] }
  0xaf   : > { %660 = vadd.xlane.f32.xlu0 %v3497_v0  ;;  %664 = vadd.xlane.f32.xlu1 %v3500_v1  ;;  %v3505_v2 = vld [vmem:[%s3470_s7 + $0x8] sm:$0xff]  ;;  %v3508_v3 = vld [vmem:[%s3470_s7 + $0x18] sm:$0xff]  ;;  %v3514_v4 = vld [vmem:[%s3470_s7 + $0x20] sm:$0xff]  ;;  %1257 = vst [vmem:[#allocation2 + $0x7] sm:$0x1] %v3177_v10  ;;  %s3970_s24 = scalar_lea.vmem [#allocation14], %s2250_s25 }
  0xb0   : > { %2430 = vmatprep.mubr.f32.mxu0 %v3497_v0  ;;  %v3517_v5 = vld [vmem:[%s3470_s7 + $0x28] sm:$0xff]  ;;  %v3522_v6 = vld [vmem:[%s3470_s7 + $0x30] sm:$0xff]  ;;  %v3525_v7 = vld [vmem:[%s3470_s7 + $0x38] sm:$0xff]  ;;  %1258 = vst [vmem:[#allocation2 + $0x27] sm:$0x1] %v3177_v10  ;;  %v479_v33 = vand.u32 127, %v478_v32 }
  0xb1   : > { %v3530_v8 = vld [vmem:[%s3470_s7 + $0x40] sm:$0xff]  ;;  %v3533_v9 = vld [vmem:[%s3470_s7 + $0x48] sm:$0xff]  ;;  %1259 = vst [vmem:[#allocation2 + $0x47] sm:$0x1] %v3177_v10  ;;  %1260 = vst [vmem:[#allocation2 + $0x67] sm:$0x1] %v3177_v10 }
  0xb2   : > { %1261 = vst [vmem:[#allocation2 + $0x87] sm:$0x1] %v3177_v10  ;;  %1262 = vst [vmem:[#allocation2 + $0xa7] sm:$0x1] %v3177_v10  ;;  %v3558_v11 = vld [vmem:[%s3470_s7 + $0x50] sm:$0xff]  ;;  %v3561_v12 = vld [vmem:[%s3470_s7 + $0x58] sm:$0xff] }
  0xb3   : > { %662 = vadd.xlane.f32.xlu0 %v3505_v2  ;;  %666 = vadd.xlane.f32.xlu1 %v3508_v3  ;;  %1263 = vst [vmem:[#allocation2 + $0xc7] sm:$0x1] %v3177_v10  ;;  %1264 = vst [vmem:[#allocation2 + $0xe7] sm:$0x1] %v3177_v10  ;;  %v3566_v13 = vld [vmem:[%s3470_s7 + $0x60] sm:$0xff]  ;;  %v3574_v15 = vld [vmem:[%s3470_s7 + $0x68] sm:$0xff] }
  0xb4   : > { %1265 = vst [vmem:[#allocation2 + $0x107] sm:$0x1] %v3177_v10  ;;  %1266 = vst [vmem:[#allocation2 + $0x127] sm:$0x1] %v3177_v10  ;;  %v3569_v14 = vld [vmem:[%s3478_s8] sm:$0xff]  ;;  %v3577_v16 = vld [vmem:[%s3478_s8 + $0x8] sm:$0xff] }
  0xb5   : > { %1267 = vst [vmem:[#allocation2 + $0x18] sm:$0x1] %v3177_v10  ;;  %1268 = vst [vmem:[#allocation2 + $0x38] sm:$0x1] %v3177_v10  ;;  %v3582_v17 = vld [vmem:[%s3470_s7 + $0x70] sm:$0xff]  ;;  %v3590_v19 = vld [vmem:[%s3470_s7 + $0x78] sm:$0xff] }
  0xb6   : > { %1269 = vst [vmem:[#allocation2 + $0x58] sm:$0x1] %v3177_v10  ;;  %1270 = vst [vmem:[#allocation2 + $0x78] sm:$0x1] %v3177_v10  ;;  %v3585_v18 = vld [vmem:[%s3478_s8 + $0x10] sm:$0xff]  ;;  %v3593_v20 = vld [vmem:[%s3478_s8 + $0x18] sm:$0xff] }
  0xb7   : > { %668 = vadd.xlane.f32.xlu0 %v3514_v4  ;;  %670 = vadd.xlane.f32.xlu1 %v3517_v5  ;;  %1271 = vst [vmem:[#allocation2 + $0x98] sm:$0x1] %v3177_v10  ;;  %1272 = vst [vmem:[#allocation2 + $0xb8] sm:$0x1] %v3177_v10  ;;  %v514_v21 = vld [vmem:[#allocation12 + $0x78] sm:$0xff]  ;;  %v513_v22 = vld [vmem:[#allocation12 + $0x70] sm:$0xff] }
  0xb8   : > { %1273 = vst [vmem:[#allocation2 + $0xd8] sm:$0x1] %v3177_v10  ;;  %1274 = vst [vmem:[#allocation2 + $0xf8] sm:$0x1] %v3177_v10  ;;  %2398 = vmatprep.subr.mxu0 %v514_v21  ;;  %v3597_v23 = vld [vmem:[#allocation8 + $0x78] sm:$0xff]  ;;  %v3599_v24 = vld [vmem:[#allocation8 + $0x70] sm:$0xff] }
  0xb9   : > { %1275 = vst [vmem:[#allocation2 + $0x118] sm:$0x1] %v3177_v10  ;;  %1276 = vst [vmem:[#allocation2 + $0x138] sm:$0x1] %v3177_v10  ;;  %2399 = vmatpush3.msra.mxu0 %v514_v21  ;;  %v512_v25 = vld [vmem:[#allocation12 + $0x68] sm:$0xff]  ;;  %2454 = vmatprep.subr.mxu1 %v3597_v23  ;;  %v3603_v26 = vld [vmem:[#allocation8 + $0x68] sm:$0xff] }
  0xba   : > { %2400 = vmatprep.subr.mxu0 %v513_v22  ;;  %2455 = vmatpush3.msra.mxu1 %v3597_v23  ;;  %v511_v27 = vld [vmem:[#allocation12 + $0x60] sm:$0xff]  ;;  %v3607_v28 = vld [vmem:[#allocation8 + $0x60] sm:$0xff]  ;;  %v510_v29 = vld [vmem:[#allocation12 + $0x58] sm:$0xff]  ;;  %vm480_vm0 = vcmp.lt.s32.totalorder %v479_v33, 4  ;;  %s4593_s17 = sld [smem:[#allocation24_spill]] }
  0xbb   : > { %672 = vadd.xlane.f32.xlu0 %v3522_v6  ;;  %674 = vadd.xlane.f32.xlu1 %v3525_v7  ;;  %v509_v30 = vld [vmem:[#allocation12 + $0x50] sm:$0xff]  ;;  %v508_v31 = vld [vmem:[#allocation12 + $0x48] sm:$0xff]  ;;  %v3614_v38 = vsel %vm480_vm0, 1.0, %v3177_v10 }
  0xbc   : > { %2401 = vmatpush3.msra.mxu0 %v513_v22  ;;  %2456 = vmatprep.subr.mxu1 %v3599_v24 }
  0xbd   : > { %2402 = vmatprep.subr.mxu0 %v512_v25  ;;  %2457 = vmatpush3.msra.mxu1 %v3599_v24 }
  0xbe   : > { %2403 = vmatpush3.msra.mxu0 %v512_v25  ;;  %2458 = vmatprep.subr.mxu1 %v3603_v26 }
  0xbf   : > { %676 = vadd.xlane.f32.xlu0 %v3530_v8  ;;  %678 = vadd.xlane.f32.xlu1 %v3533_v9 }
  0xc0   : > { %2404 = vmatprep.subr.mxu0 %v511_v27  ;;  %2459 = vmatpush3.msra.mxu1 %v3603_v26  ;;  %p2259_p5 = scmp.ne.s32.totalorder %s4593_s17, 0 }
  0xc1   : > { %2405 = vmatpush3.msra.mxu0 %v511_v27  ;;  %2460 = vmatprep.subr.mxu1 %v3607_v28 }
  0xc2   : > { %2406 = vmatprep.subr.mxu0 %v510_v29  ;;  %2461 = vmatpush3.msra.mxu1 %v3607_v28 }
  0xc3   : > { %680 = vadd.xlane.f32.xlu0 %v3558_v11  ;;  %682 = vadd.xlane.f32.xlu1 %v3561_v12 }
  0xc4   : > { %2407 = vmatpush3.msra.mxu0 %v510_v29 }
  0xc5   : > { %2408 = vmatprep.subr.mxu0 %v509_v30 }
  0xc6   : > { %2409 = vmatpush3.msra.mxu0 %v509_v30 }
  0xc7   : > { %684 = vadd.xlane.f32.xlu0 %v3566_v13  ;;  %1104 = vadd.xlane.f32.xlu1 %v3569_v14 }
  0xc8   : > { %2410 = vmatprep.subr.mxu0 %v508_v31 }
  0xc9   : > { %2411 = vmatpush3.msra.mxu0 %v508_v31 }
  0xcb   : > { %686 = vadd.xlane.f32.xlu0 %v3574_v15  ;;  %1106 = vadd.xlane.f32.xlu1 %v3577_v16 }
  0xcf   : > { %688 = vadd.xlane.f32.xlu0 %v3582_v17  ;;  %1108 = vadd.xlane.f32.xlu1 %v3585_v18 }
  0xd3   : > { %690 = vadd.xlane.f32.xlu0 %v3590_v19  ;;  %1110 = vadd.xlane.f32.xlu1 %v3593_v20 }
 0x138   : > { %v661_v34 = vpop.xlane.xlu0 %660  ;;  %v665_v35 = vpop.xlane.xlu1 %664 }
 0x139   : > { %v692_v36 = vmul.f32 0.25, %v661_v34  ;;  %v694_v37 = vmul.f32 0.25, %v665_v35 }
 0x13b   : > { %v708_v39 = vsub.f32 %v3497_v0, %v692_v36  ;;  %v710_v40 = vsub.f32 %v3500_v1, %v694_v37  ;;  %v3660_v36 = vld [vmem:[#allocation8 + $0x58] sm:$0xff] }
 0x13c   : > { %v663_v41 = vpop.xlane.xlu0 %662  ;;  %v667_v42 = vpop.xlane.xlu1 %666  ;;  %2462 = vmatprep.subr.mxu1 %v3660_v36 }
 0x13d   : > { %v693_v43 = vmul.f32 0.25, %v663_v41  ;;  %v695_v44 = vmul.f32 0.25, %v667_v42  ;;  %v3619_v45 = vmul.f32 %v3614_v38, %v708_v39  ;;  %v3622_v46 = vmul.f32 %v3614_v38, %v710_v40  ;;  %v507_v41 = vld [vmem:[#allocation12 + $0x40] sm:$0xff]  ;;  %2463 = vmatpush3.msra.mxu1 %v3660_v36 }
 0x13e   : > { %2412 = vmatprep.subr.mxu0 %v507_v41 }
 0x13f   : > { %v709_v47 = vsub.f32 %v3505_v2, %v693_v43  ;;  %v711_v48 = vsub.f32 %v3508_v3, %v695_v44  ;;  %v740_v49 = vmul.f32 %v3619_v45, %v3619_v45  ;;  %v742_v52 = vmul.f32 %v3622_v46, %v3622_v46  ;;  %2413 = vmatpush3.msra.mxu0 %v507_v41 }
 0x140   : > { %v669_v50 = vpop.xlane.xlu0 %668  ;;  %v671_v51 = vpop.xlane.xlu1 %670 }
 0x141   : > { %v696_v53 = vmul.f32 0.25, %v669_v50  ;;  %756 = vadd.xlane.f32.xlu0 %v740_v49  ;;  %v697_v54 = vmul.f32 0.25, %v671_v51  ;;  %v3631_v55 = vmul.f32 %v3614_v38, %v709_v47  ;;  %v3634_v56 = vmul.f32 %v3614_v38, %v711_v48  ;;  %v3670_v47 = vld [vmem:[#allocation8 + $0x50] sm:$0xff] }
 0x142   : > { %2464 = vmatprep.subr.mxu1 %v3670_v47 }
 0x143   : > { %v712_v57 = vsub.f32 %v3514_v4, %v696_v53  ;;  %v713_v58 = vsub.f32 %v3517_v5, %v697_v54  ;;  %v741_v59 = vmul.f32 %v3631_v55, %v3631_v55  ;;  %v743_v62 = vmul.f32 %v3634_v56, %v3634_v56  ;;  %2465 = vmatpush3.msra.mxu1 %v3670_v47 }
 0x144   : > { %v673_v60 = vpop.xlane.xlu0 %672  ;;  %v675_v61 = vpop.xlane.xlu1 %674 }
 0x145   : > { %v698_v63 = vmul.f32 0.25, %v673_v60  ;;  %760 = vadd.xlane.f32.xlu0 %v742_v52  ;;  %758 = vadd.xlane.f32.xlu1 %v741_v59  ;;  %v699_v0 = vmul.f32 0.25, %v675_v61  ;;  %v3643_v10 = vmul.f32 %v3614_v38, %v712_v57  ;;  %v3646_v21 = vmul.f32 %v3614_v38, %v713_v58  ;;  %v506_v52 = vld [vmem:[#allocation12 + $0x38] sm:$0xff] }
 0x146   : > { %2414 = vmatprep.subr.mxu0 %v506_v52  ;;  %v3683_v58 = vld [vmem:[#allocation8 + $0x48] sm:$0xff] }
 0x147   : > { %v714_v22 = vsub.f32 %v3522_v6, %v698_v63  ;;  %v715_v25 = vsub.f32 %v3525_v7, %v699_v0  ;;  %v744_v27 = vmul.f32 %v3643_v10, %v3643_v10  ;;  %v745_v31 = vmul.f32 %v3646_v21, %v3646_v21  ;;  %2415 = vmatpush3.msra.mxu0 %v506_v52 }
 0x148   : > { %v677_v29 = vpop.xlane.xlu0 %676  ;;  %v679_v30 = vpop.xlane.xlu1 %678  ;;  %2466 = vmatprep.subr.mxu1 %v3683_v58 }
 0x149   : > { %v700_v32 = vmul.f32 0.25, %v677_v29  ;;  %762 = vadd.xlane.f32.xlu1 %v743_v62  ;;  %764 = vadd.xlane.f32.xlu0 %v744_v27  ;;  %v701_v33 = vmul.f32 0.25, %v679_v30  ;;  %v3655_v34 = vmul.f32 %v3614_v38, %v714_v22  ;;  %v3658_v35 = vmul.f32 %v3614_v38, %v715_v25  ;;  %v505_v62 = vld [vmem:[#allocation12 + $0x30] sm:$0xff] }
 0x14a   : > { %v3694_v27 = vld [vmem:[#allocation8 + $0x40] sm:$0xff]  ;;  %2416 = vmatprep.subr.mxu0 %v505_v62  ;;  %2467 = vmatpush3.msra.mxu1 %v3683_v58 }
 0x14b   : > { %v716_v37 = vsub.f32 %v3530_v8, %v700_v32  ;;  %v717_v39 = vsub.f32 %v3533_v9, %v701_v33  ;;  %v746_v40 = vmul.f32 %v3655_v34, %v3655_v34  ;;  %v747_v44 = vmul.f32 %v3658_v35, %v3658_v35  ;;  %v504_v32 = vld [vmem:[#allocation12 + $0x28] sm:$0xff]  ;;  %2417 = vmatpush3.msra.mxu0 %v505_v62 }
 0x14c   : > { %v681_v42 = vpop.xlane.xlu0 %680  ;;  %v683_v43 = vpop.xlane.xlu1 %682  ;;  %2468 = vmatprep.subr.mxu1 %v3694_v27  ;;  %2418 = vmatprep.subr.mxu0 %v504_v32 }
 0x14d   : > { %v702_v48 = vmul.f32 0.25, %v681_v42  ;;  %766 = vadd.xlane.f32.xlu1 %v745_v31  ;;  %768 = vadd.xlane.f32.xlu0 %v746_v40  ;;  %v703_v49 = vmul.f32 0.25, %v683_v43  ;;  %v3673_v50 = vmul.f32 %v3614_v38, %v716_v37  ;;  %v3676_v51 = vmul.f32 %v3614_v38, %v717_v39  ;;  %v3711_v43 = vld [vmem:[#allocation8 + $0x38] sm:$0xff] }
 0x14e   : > { %2469 = vmatpush3.msra.mxu1 %v3694_v27  ;;  %2419 = vmatpush3.msra.mxu0 %v504_v32 }
 0x14f   : > { %v718_v53 = vsub.f32 %v3558_v11, %v702_v48  ;;  %v719_v54 = vsub.f32 %v3561_v12, %v703_v49  ;;  %v748_v57 = vmul.f32 %v3673_v50, %v3673_v50  ;;  %v749_v61 = vmul.f32 %v3676_v51, %v3676_v51  ;;  %2470 = vmatprep.subr.mxu1 %v3711_v43 }
 0x150   : > { %v685_v59 = vpop.xlane.xlu0 %684  ;;  %v1105_v60 = vpop.xlane.xlu1 %1104  ;;  %2471 = vmatpush3.msra.mxu1 %v3711_v43 }
 0x151   : > { %v704_v63 = vmul.f32 0.25, %v685_v59  ;;  %770 = vadd.xlane.f32.xlu1 %v747_v44  ;;  %772 = vadd.xlane.f32.xlu0 %v748_v57  ;;  %v1112_v0 = vmul.f32 0.25, %v1105_v60  ;;  %v3689_v22 = vmul.f32 %v3614_v38, %v718_v53  ;;  %v3692_v25 = vmul.f32 %v3614_v38, %v719_v54  ;;  %v503_v44 = vld [vmem:[#allocation12 + $0x20] sm:$0xff] }
 0x152   : > { %2420 = vmatprep.subr.mxu0 %v503_v44  ;;  %v3721_v59 = vld [vmem:[#allocation8 + $0x30] sm:$0xff] }
 0x153   : > { %v720_v29 = vsub.f32 %v3566_v13, %v704_v63  ;;  %v1116_v30 = vsub.f32 %v3569_v14, %v1112_v0  ;;  %v750_v31 = vmul.f32 %v3689_v22, %v3689_v22  ;;  %v751_v39 = vmul.f32 %v3692_v25, %v3692_v25  ;;  %v502_v63 = vld [vmem:[#allocation12 + $0x18] sm:$0xff]  ;;  %2421 = vmatpush3.msra.mxu0 %v503_v44 }
 0x154   : > { %v687_v33 = vpop.xlane.xlu0 %686  ;;  %v1107_v37 = vpop.xlane.xlu1 %1106  ;;  %2472 = vmatprep.subr.mxu1 %v3721_v59  ;;  %2422 = vmatprep.subr.mxu0 %v502_v63 }
 0x155   : > { %v705_v40 = vmul.f32 0.25, %v687_v33  ;;  %774 = vadd.xlane.f32.xlu1 %v749_v61  ;;  %776 = vadd.xlane.f32.xlu0 %v750_v31  ;;  %v1113_v41 = vmul.f32 0.25, %v1107_v37  ;;  %v3706_v14 = vmul.f32 %v3614_v38, %v720_v29  ;;  %v3709_v42 = vmul.f32 %v3614_v38, %v1116_v30  ;;  %v3735_v31 = vld [vmem:[#allocation8 + $0x28] sm:$0xff] }
 0x156   : > { %2473 = vmatpush3.msra.mxu1 %v3721_v59  ;;  %2423 = vmatpush3.msra.mxu0 %v502_v63  ;;  %v499_v63 = vld [vmem:[#allocation12] sm:$0xff] }
 0x157   : > { %v721_v48 = vsub.f32 %v3574_v15, %v705_v40  ;;  %v1117_v49 = vsub.f32 %v3577_v16, %v1113_v41  ;;  %v752_v52 = vmul.f32 %v3706_v14, %v3706_v14  ;;  %v1124_v57 = vmul.f32 %v3709_v42, %v3709_v42  ;;  %2474 = vmatprep.subr.mxu1 %v3735_v31 }
 0x158   : > { %v689_v53 = vpop.xlane.xlu0 %688  ;;  %v1109_v54 = vpop.xlane.xlu1 %1108  ;;  %2475 = vmatpush3.msra.mxu1 %v3735_v31 }
 0x159   : > { %v706_v60 = vmul.f32 0.25, %v689_v53  ;;  %778 = vadd.xlane.f32.xlu1 %v751_v39  ;;  %780 = vadd.xlane.f32.xlu0 %v752_v52  ;;  %v1114_v61 = vmul.f32 0.25, %v1109_v54  ;;  %v3724_v16 = vmul.f32 %v3614_v38, %v721_v48  ;;  %v3727_v62 = vmul.f32 %v3614_v38, %v1117_v49  ;;  %v501_v39 = vld [vmem:[#allocation12 + $0x10] sm:$0xff]  ;;  %v500_v54 = vld [vmem:[#allocation12 + $0x8] sm:$0xff] }
 0x15a   : > { %2424 = vmatprep.subr.mxu0 %v501_v39  ;;  %v3751_v53 = vld [vmem:[#allocation8 + $0x20] sm:$0xff] }
 0x15b   : > { %v722_v0 = vsub.f32 %v3582_v17, %v706_v60  ;;  %v1118_v29 = vsub.f32 %v3585_v18, %v1114_v61  ;;  %v753_v30 = vmul.f32 %v3724_v16, %v3724_v16  ;;  %v1125_v37 = vmul.f32 %v3727_v62, %v3727_v62  ;;  %2425 = vmatpush3.msra.mxu0 %v501_v39  ;;  %v855_v61 = vld [vmem:[#allocation8 + $0x18] sm:$0xff] }
 0x15c   : > { %v691_v32 = vpop.xlane.xlu0 %690  ;;  %v1111_v33 = vpop.xlane.xlu1 %1110  ;;  %2476 = vmatprep.subr.mxu1 %v3751_v53  ;;  %2426 = vmatprep.subr.mxu0 %v500_v54 }
 0x15d   : > { %v707_v40 = vmul.f32 0.25, %v691_v32  ;;  %1128 = vadd.xlane.f32.xlu1 %v1124_v57  ;;  %782 = vadd.xlane.f32.xlu0 %v753_v30  ;;  %v1115_v18 = vmul.f32 0.25, %v1111_v33  ;;  %v3741_v41 = vmul.f32 %v3614_v38, %v722_v0  ;;  %v3744_v44 = vmul.f32 %v3614_v38, %v1118_v29  ;;  %v854_v29 = vld [vmem:[#allocation8 + $0x10] sm:$0xff]  ;;  %v853_v30 = vld [vmem:[#allocation8 + $0x8] sm:$0xff]  ;;  %v852_v32 = vld [vmem:[#allocation8] sm:$0xff] }
 0x15e   : > { %2477 = vmatpush3.msra.mxu1 %v3751_v53  ;;  %2427 = vmatpush3.msra.mxu0 %v500_v54 }
 0x15f   : > { %v723_v48 = vsub.f32 %v3590_v19, %v707_v40  ;;  %v1119_v49 = vsub.f32 %v3593_v20, %v1115_v18  ;;  %v754_v52 = vmul.f32 %v3741_v41, %v3741_v41  ;;  %v1126_v57 = vmul.f32 %v3744_v44, %v3744_v44  ;;  %2478 = vmatprep.subr.mxu1 %v855_v61 }
 0x160   : > { %2428 = vmatprep.subr.mxu0 %v499_v63  ;;  %2479 = vmatpush3.msra.mxu1 %v855_v61 }
 0x161   : > { %1130 = vadd.xlane.f32.xlu1 %v1125_v37  ;;  %784 = vadd.xlane.f32.xlu0 %v754_v52  ;;  %v3757_v60 = vmul.f32 %v3614_v38, %v723_v48  ;;  %v3760_v20 = vmul.f32 %v3614_v38, %v1119_v49 }
 0x162   : > { %2429 = vmatpush3.msra.mxu0 %v499_v63  ;;  %2480 = vmatprep.subr.mxu1 %v854_v29 }
 0x163   : > { %v755_v0 = vmul.f32 %v3757_v60, %v3757_v60  ;;  %v1127_v38 = vmul.f32 %v3760_v20, %v3760_v20  ;;  %2431 = vmatmul.mubr.f32.vlgmr.msra.gmra.mxu0 %v3505_v2  ;;  %2481 = vmatpush3.msra.mxu1 %v854_v29 }
 0x164   : > { %2510 = vmatprep.subr.mxu0 %v3597_v23  ;;  %2482 = vmatprep.subr.mxu1 %v853_v30 }
 0x165   : > { %1132 = vadd.xlane.f32.xlu1 %v1126_v57  ;;  %786 = vadd.xlane.f32.xlu0 %v755_v0 }
 0x166   : > { %2483 = vmatpush3.msra.mxu1 %v853_v30  ;;  %2511 = vmatpush3.msra.mxu0 %v3597_v23 }
 0x167   : > { %2433 = vmatprep.mubr.f32.mxu0 %v3500_v1  ;;  %2484 = vmatprep.subr.mxu1 %v852_v32 }
 0x168   : > { %2512 = vmatprep.subr.mxu0 %v3599_v24  ;;  %2485 = vmatpush3.msra.mxu1 %v852_v32 }
 0x169   : > { %1134 = vadd.xlane.f32.xlu1 %v1127_v38  ;;  %2434 = vmatmul.mubr.f32.gmra.mxu0 %v3508_v3 }
 0x16a   : > { %2513 = vmatpush3.msra.mxu0 %v3599_v24  ;;  %2436 = vmatprep.mubr.f32.mxu0 %v3514_v4 }
 0x16b   : > { %2514 = vmatprep.subr.mxu0 %v3603_v26 }
 0x16c   : > { %2515 = vmatpush3.msra.mxu0 %v3603_v26 }
 0x16d   : > { %2516 = vmatprep.subr.mxu0 %v3607_v28  ;;  %2437 = vmatmul.mubr.f32.gmra.mxu0 %v3517_v5 }
 0x16e   : > { %2517 = vmatpush3.msra.mxu0 %v3607_v28  ;;  %2439 = vmatprep.mubr.f32.mxu0 %v3522_v6 }
 0x16f   : > { %2518 = vmatprep.subr.mxu0 %v3660_v36 }
 0x170   : > { %2519 = vmatpush3.msra.mxu0 %v3660_v36 }
 0x171   : > { %2520 = vmatprep.subr.mxu0 %v3670_v47  ;;  %2440 = vmatmul.mubr.f32.gmra.mxu0 %v3525_v7 }
 0x172   : > { %2521 = vmatpush3.msra.mxu0 %v3670_v47  ;;  %2442 = vmatprep.mubr.f32.mxu0 %v3530_v8 }
 0x173   : > { %2522 = vmatprep.subr.mxu0 %v3683_v58 }
 0x174   : > { %2523 = vmatpush3.msra.mxu0 %v3683_v58 }
 0x175   : > { %2524 = vmatprep.subr.mxu0 %v3694_v27  ;;  %2443 = vmatmul.mubr.f32.gmra.mxu0 %v3533_v9 }
 0x176   : > { %2525 = vmatpush3.msra.mxu0 %v3694_v27  ;;  %2445 = vmatprep.mubr.f32.mxu0 %v3558_v11 }
 0x177   : > { %2526 = vmatprep.subr.mxu0 %v3711_v43 }
 0x178   : > { %2527 = vmatpush3.msra.mxu0 %v3711_v43 }
 0x179   : > { %2528 = vmatprep.subr.mxu0 %v3721_v59  ;;  %2446 = vmatmul.mubr.f32.gmra.mxu0 %v3561_v12 }
 0x17a   : > { %2529 = vmatpush3.msra.mxu0 %v3721_v59  ;;  %2448 = vmatprep.mubr.f32.mxu0 %v3566_v13 }
 0x17b   : > { %2530 = vmatprep.subr.mxu0 %v3735_v31 }
 0x17c   : > { %2531 = vmatpush3.msra.mxu0 %v3735_v31 }
 0x17d   : > { %2532 = vmatprep.subr.mxu0 %v3751_v53  ;;  %2449 = vmatmul.mubr.f32.gmra.mxu0 %v3574_v15 }
 0x17e   : > { %2533 = vmatpush3.msra.mxu0 %v3751_v53  ;;  %2451 = vmatprep.mubr.f32.mxu0 %v3582_v17 }
 0x17f   : > { %2534 = vmatprep.subr.mxu0 %v855_v61 }
 0x180   : > { %2535 = vmatpush3.msra.mxu0 %v855_v61 }
 0x181   : > { %2536 = vmatprep.subr.mxu0 %v854_v29  ;;  %2452 = vmatmul.mubr.f32.gmra.mxu0 %v3590_v19 }
 0x182   : > { %2537 = vmatpush3.msra.mxu0 %v854_v29 }
 0x183   : > { %2538 = vmatprep.subr.mxu0 %v853_v30 }
 0x184   : > { %2539 = vmatpush3.msra.mxu0 %v853_v30 }
 0x185   : > { %2540 = vmatprep.subr.mxu0 %v852_v32 }
 0x186   : > { %2541 = vmatpush3.msra.mxu0 %v852_v32 }
 0x1ca   : > { %v757_v1 = vpop.xlane.xlu0 %756 }
 0x1cb   : > { %v788_v2 = vmul.f32 0.25, %v757_v1 }
 0x1cd   : > { %v804_v3 = vadd.f32 1e-06, %v788_v2 }
 0x1ce   : > { %v759_v4 = vpop.xlane.xlu1 %758  ;;  %v761_v5 = vpop.xlane.xlu0 %760 }
 0x1cf   : > { %2759 = vrsqrt.f32 %v804_v3  ;;  %v789_v6 = vmul.f32 0.25, %v759_v4  ;;  %v790_v7 = vmul.f32 0.25, %v761_v5 }
 0x1d1   : > { %v805_v8 = vadd.f32 1e-06, %v789_v6  ;;  %v806_v9 = vadd.f32 1e-06, %v790_v7 }
 0x1d2   : > { %v763_v11 = vpop.xlane.xlu1 %762  ;;  %v765_v12 = vpop.xlane.xlu0 %764 }
 0x1d3   : > { %2761 = vrsqrt.f32 %v805_v8  ;;  %v791_v13 = vmul.f32 0.25, %v763_v11  ;;  %v792_v15 = vmul.f32 0.25, %v765_v12 }
 0x1d4   : > { %2763 = vrsqrt.f32 %v806_v9 }
 0x1d5   : > { %v807_v17 = vadd.f32 1e-06, %v791_v13  ;;  %v808_v19 = vadd.f32 1e-06, %v792_v15 }
 0x1d6   : > { %v767_v23 = vpop.xlane.xlu1 %766  ;;  %v769_v24 = vpop.xlane.xlu0 %768 }
 0x1d7   : > { %2765 = vrsqrt.f32 %v807_v17  ;;  %v793_v26 = vmul.f32 0.25, %v767_v23  ;;  %v794_v28 = vmul.f32 0.25, %v769_v24 }
 0x1d8   : > { %2767 = vrsqrt.f32 %v808_v19 }
 0x1d9   : > { %v809_v36 = vadd.f32 1e-06, %v793_v26  ;;  %v810_v47 = vadd.f32 1e-06, %v794_v28 }
 0x1da   : > { %v771_v58 = vpop.xlane.xlu1 %770  ;;  %v773_v27 = vpop.xlane.xlu0 %772 }
 0x1db   : > { %2769 = vrsqrt.f32 %v809_v36  ;;  %v795_v43 = vmul.f32 0.25, %v771_v58  ;;  %v796_v59 = vmul.f32 0.25, %v773_v27 }
 0x1dc   : > { %v2760_v31 = vpop.eup %2759  ;;  %2771 = vrsqrt.f32 %v810_v47 }
 0x1dd   : > { %v811_v33 = vadd.f32 1e-06, %v795_v43  ;;  %v812_v37 = vadd.f32 1e-06, %v796_v59  ;;  %v836_v39 = vmul.f32 %v2760_v31, %v3619_v45 }
 0x1de   : > { %v775_v40 = vpop.xlane.xlu1 %774  ;;  %v777_v18 = vpop.xlane.xlu0 %776 }
 0x1df   : > { %2773 = vrsqrt.f32 %v811_v33  ;;  %v797_v48 = vmul.f32 0.25, %v775_v40  ;;  %v798_v49 = vmul.f32 0.25, %v777_v18  ;;  %2486 = vmatprep.mubr.f32.mxu1 %v836_v39 }
 0x1e0   : > { %v2762_v52 = vpop.eup %2761  ;;  %2775 = vrsqrt.f32 %v812_v37 }
 0x1e1   : > { %v2764_v53 = vpop.eup %2763  ;;  %v813_v54 = vadd.f32 1e-06, %v797_v48  ;;  %v814_v57 = vadd.f32 1e-06, %v798_v49  ;;  %v837_v61 = vmul.f32 %v2762_v52, %v3631_v55 }
 0x1e2   : > { %v779_v63 = vpop.xlane.xlu1 %778  ;;  %v781_v0 = vpop.xlane.xlu0 %780  ;;  %v838_v29 = vmul.f32 %v2764_v53, %v3622_v46 }
 0x1e3   : > { %2777 = vrsqrt.f32 %v813_v54  ;;  %v799_v38 = vmul.f32 0.25, %v779_v63  ;;  %v800_v45 = vmul.f32 0.25, %v781_v0  ;;  %2487 = vmatmul.mubr.f32.vlgmr.msra.gmra.mxu1 %v837_v61 }
 0x1e4   : > { %v2766_v30 = vpop.eup %2765  ;;  %2779 = vrsqrt.f32 %v814_v57  ;;  %2489 = vmatprep.mubr.f32.mxu1 %v838_v29 }
 0x1e5   : > { %v2768_v32 = vpop.eup %2767  ;;  %v815_v1 = vadd.f32 1e-06, %v799_v38  ;;  %v816_v2 = vadd.f32 1e-06, %v800_v45  ;;  %v839_v3 = vmul.f32 %v2766_v30, %v3634_v56 }
 0x1e6   : > { %v1129_v4 = vpop.xlane.xlu1 %1128  ;;  %v783_v5 = vpop.xlane.xlu0 %782  ;;  %v840_v55 = vmul.f32 %v2768_v32, %v3643_v10 }
 0x1e7   : > { %2781 = vrsqrt.f32 %v815_v1  ;;  %v1136_v6 = vmul.f32 0.25, %v1129_v4  ;;  %v801_v7 = vmul.f32 0.25, %v783_v5  ;;  %2490 = vmatmul.mubr.f32.gmra.mxu1 %v839_v3 }
 0x1e8   : > { %v2770_v46 = vpop.eup %2769  ;;  %2783 = vrsqrt.f32 %v816_v2  ;;  %2492 = vmatprep.mubr.f32.mxu1 %v840_v55 }
 0x1e9   : > { %v2772_v8 = vpop.eup %2771  ;;  %v1140_v9 = vadd.f32 1e-06, %v1136_v6  ;;  %v817_v11 = vadd.f32 1e-06, %v801_v7  ;;  %v841_v12 = vmul.f32 %v2770_v46, %v3646_v21  ;;  %v3862_v7 = vld [vmem:[%s4592_s28] ss:$0 sm:$0xff] }
 0x1ea   : > { %v1131_v13 = vpop.xlane.xlu1 %1130  ;;  %v785_v15 = vpop.xlane.xlu0 %784  ;;  %v842_v56 = vmul.f32 %v2772_v8, %v3655_v34 }
 0x1eb   : > { %2785 = vrsqrt.f32 %v1140_v9  ;;  %v1137_v17 = vmul.f32 0.25, %v1131_v13  ;;  %v802_v19 = vmul.f32 0.25, %v785_v15  ;;  %2493 = vmatmul.mubr.f32.gmra.mxu1 %v841_v12 }
 0x1ec   : > { %v2774_v10 = vpop.eup %2773  ;;  %2787 = vrsqrt.f32 %v817_v11  ;;  %2495 = vmatprep.mubr.f32.mxu1 %v842_v56 }
 0x1ed   : > { %v2776_v23 = vpop.eup %2775  ;;  %v1141_v24 = vadd.f32 1e-06, %v1137_v17  ;;  %v818_v26 = vadd.f32 1e-06, %v802_v19  ;;  %v843_v28 = vmul.f32 %v2774_v10, %v3658_v35 }
 0x1ee   : > { %v1133_v36 = vpop.xlane.xlu1 %1132  ;;  %v787_v47 = vpop.xlane.xlu0 %786  ;;  %v844_v21 = vmul.f32 %v2776_v23, %v3673_v50 }
 0x1ef   : > { %2789 = vrsqrt.f32 %v1141_v24  ;;  %v1138_v58 = vmul.f32 0.25, %v1133_v36  ;;  %v803_v27 = vmul.f32 0.25, %v787_v47  ;;  %2496 = vmatmul.mubr.f32.gmra.mxu1 %v843_v28 }
 0x1f0   : > { %v2778_v34 = vpop.eup %2777  ;;  %2791 = vrsqrt.f32 %v818_v26  ;;  %2498 = vmatprep.mubr.f32.mxu1 %v844_v21 }
 0x1f1   : > { %v2780_v43 = vpop.eup %2779  ;;  %v1142_v59 = vadd.f32 1e-06, %v1138_v58  ;;  %v819_v31 = vadd.f32 1e-06, %v803_v27  ;;  %v845_v33 = vmul.f32 %v2778_v34, %v3676_v51 }
 0x1f2   : > { %v1135_v37 = vpop.xlane.xlu1 %1134  ;;  %v846_v39 = vmul.f32 %v2780_v43, %v3689_v22 }
 0x1f3   : > { %2793 = vrsqrt.f32 %v1142_v59  ;;  %v1139_v35 = vmul.f32 0.25, %v1135_v37  ;;  %2499 = vmatmul.mubr.f32.gmra.mxu1 %v845_v33 }
 0x1f4   : > { %v2782_v40 = vpop.eup %2781  ;;  %2795 = vrsqrt.f32 %v819_v31  ;;  %2501 = vmatprep.mubr.f32.mxu1 %v846_v39 }
 0x1f5   : > { %v2784_v50 = vpop.eup %2783  ;;  %v1143_v18 = vadd.f32 1e-06, %v1139_v35  ;;  %v847_v48 = vmul.f32 %v2782_v40, %v3692_v25 }
 0x1f6   : > { %v848_v49 = vmul.f32 %v2784_v50, %v3706_v14 }
 0x1f7   : > { %2797 = vrsqrt.f32 %v1143_v18  ;;  %2502 = vmatmul.mubr.f32.gmra.mxu1 %v847_v48 }
 0x1f8   : > { %v2786_v52 = vpop.eup %2785  ;;  %2504 = vmatprep.mubr.f32.mxu1 %v848_v49 }
 0x1f9   : > { %v2788_v51 = vpop.eup %2787  ;;  %v1148_v53 = vmul.f32 %v2786_v52, %v3709_v42 }
 0x1fa   : > { %v849_v22 = vmul.f32 %v2788_v51, %v3724_v16 }
 0x1fb   : > { %2542 = vmatprep.mubr.f32.mxu0 %v1148_v53 }
 0x1fc   : > { %v2790_v54 = vpop.eup %2789  ;;  %2505 = vmatmul.mubr.f32.gmra.mxu1 %v849_v22 }
 0x1fd   : > { %v2792_v57 = vpop.eup %2791  ;;  %v1149_v61 = vmul.f32 %v2790_v54, %v3727_v62 }
 0x1fe   : > { %v850_v63 = vmul.f32 %v2792_v57, %v3741_v41 }
 0x1ff   : > { %2543 = vmatmul.mubr.f32.vlgmr.msra.gmra.mxu0 %v1149_v61 }
 0x200   : > { %v2794_v25 = vpop.eup %2793  ;;  %2507 = vmatprep.mubr.f32.mxu1 %v850_v63 }
 0x201   : > { %v2796_v14 = vpop.eup %2795  ;;  %v1150_v0 = vmul.f32 %v2794_v25, %v3744_v44 }
 0x202   : > { %v851_v29 = vmul.f32 %v2796_v14, %v3757_v60 }
 0x203   : > { %2545 = vmatprep.mubr.f32.mxu0 %v1150_v0 }
 0x204   : > { %v2798_v42 = vpop.eup %2797  ;;  %2508 = vmatmul.mubr.f32.gmra.mxu1 %v851_v29 }
 0x205   : > { %v1151_v16 = vmul.f32 %v2798_v42, %v3760_v20 }
 0x207   : > { %2546 = vmatmul.mubr.f32.gmra.mxu0 %v1151_v16 }
 0x223   : > { %v3827_v38 = vpop.f32.mrf.mxu0 }
 0x225   : > { %v3829_v45 = vpop.f32.mrf.mxu0 }
 0x229   : > { %v3831_v62 = vpop.f32.mrf.mxu0 }
 0x22a   : > { %4578 = vst [vmem:[#allocation32_spill] sm:$0xff] %v3831_v62 }
 0x22b   : > { %v3833_v41 = vpop.f32.mrf.mxu0 }
 0x22c   : > { %4579 = vst [vmem:[#allocation33_spill] sm:$0xff] %v3833_v41 }
 0x22d   : > { %v3835_v30 = vpop.f32.mrf.mxu0 }
 0x22e   : > { %4580 = vst [vmem:[#allocation34_spill] sm:$0xff] %v3835_v30 }
 0x22f   : > { %v3837_v32 = vpop.f32.mrf.mxu0 }
 0x230   : > { %4581 = vst [vmem:[#allocation35_spill] sm:$0xff] %v3837_v32 }
 0x231   : > { %v3839_v44 = vpop.f32.mrf.mxu0 }
 0x232   : > { %4582 = vst [vmem:[#allocation36_spill] sm:$0xff] %v3839_v44 }
 0x233   : > { %v3841_v60 = vpop.f32.mrf.mxu0 }
 0x234   : > { %4583 = vst [vmem:[#allocation37_spill] sm:$0xff] %v3841_v60 }
 0x235   : > { %v3843_v1 = vpop.f32.mrf.mxu0 }
 0x236   : > { %4584 = vst [vmem:[#allocation38_spill] sm:$0xff] %v3843_v1 }
 0x237   : > { %v3845_v20 = vpop.f32.mrf.mxu0 }
 0x238   : > { %4585 = vst [vmem:[#allocation39_spill] sm:$0xff] %v3845_v20 }
 0x239   : > { %v3847_v2 = vpop.f32.mrf.mxu0 }
 0x23a   : > { %4586 = vst [vmem:[#allocation40_spill] sm:$0xff] %v3847_v2 }
 0x23b   : > { %v3849_v3 = vpop.f32.mrf.mxu0 }
 0x23c   : > { %4587 = vst [vmem:[#allocation41_spill] sm:$0xff] %v3849_v3 }
 0x23d   : > { %v3851_v4 = vpop.f32.mrf.mxu0 }
 0x23e   : > { %4588 = vst [vmem:[#allocation42_spill] sm:$0xff] %v3851_v4 }
 0x23f   : > { %v3853_v5 = vpop.f32.mrf.mxu0 }
 0x240   : > { %4589 = vst [vmem:[#allocation43_spill] sm:$0xff] %v3853_v5 }
 0x241   : > { %v3855_v55 = vpop.f32.mrf.mxu0 }
 0x242   : > { %4590 = vst [vmem:[#allocation44_spill] sm:$0xff] %v3855_v55 }
 0x243   : > { %v3857_v6 = vpop.f32.mrf.mxu0 }
 0x244   : > { %4591 = vst [vmem:[#allocation45_spill] sm:$0xff] %v3857_v6 }
 0x2a3   : > { %v2488_v46 = vpop.f32.mrf.mxu1 }
 0x2a4   : > { %v947_v8 = vadd.f32 %v2488_v46, %v3862_v7 }
 0x2a5   : > { %v941_v9 = vpop.f32.mrf.mxu1 }
 0x2a6   : > { %v1037_v11 = vmul.f32 0.70710677, %v947_v8  ;;  %v942_v12 = vadd.f32 %v3862_v7, %v941_v9  ;;  %v1021_v40 = vmul.f32 0.5, %v947_v8 }
 0x2a7   : > { %v2491_v13 = vpop.f32.mrf.mxu1 }
 0x2a8   : > { %2799 = verf.f32 %v1037_v11  ;;  %v1036_v15 = vmul.f32 0.70710677, %v942_v12  ;;  %v957_v56 = vadd.f32 %v2491_v13, %v3862_v7  ;;  %v1020_v49 = vmul.f32 0.5, %v942_v12 }
 0x2a9   : > { %v951_v17 = vpop.f32.mrf.mxu1 }
 0x2aa   : > { %2801 = verf.f32 %v1036_v15  ;;  %v1039_v19 = vmul.f32 0.70710677, %v957_v56  ;;  %v952_v10 = vadd.f32 %v3862_v7, %v951_v17  ;;  %v1023_v14 = vmul.f32 0.5, %v957_v56 }
 0x2ab   : > { %v2494_v23 = vpop.f32.mrf.mxu1 }
 0x2ac   : > { %2803 = verf.f32 %v1039_v19  ;;  %v1038_v24 = vmul.f32 0.70710677, %v952_v10  ;;  %v967_v26 = vadd.f32 %v2494_v23, %v3862_v7  ;;  %v1022_v8 = vmul.f32 0.5, %v952_v10 }
 0x2ad   : > { %v961_v28 = vpop.f32.mrf.mxu1 }
 0x2ae   : > { %2805 = verf.f32 %v1038_v24  ;;  %v1041_v36 = vmul.f32 0.70710677, %v967_v26  ;;  %v962_v47 = vadd.f32 %v3862_v7, %v961_v28  ;;  %v1025_v17 = vmul.f32 0.5, %v967_v26 }
 0x2af   : > { %v2497_v21 = vpop.f32.mrf.mxu1 }
 0x2b0   : > { %2807 = verf.f32 %v1041_v36  ;;  %v1040_v58 = vmul.f32 0.70710677, %v962_v47  ;;  %v3871_v27 = vadd.f32 %v2497_v21, %v3862_v7 }
 0x2b1   : > { %v971_v34 = vpop.f32.mrf.mxu1 }
 0x2b2   : > { %2809 = verf.f32 %v1040_v58  ;;  %v1043_v43 = vmul.f32 0.70710677, %v3871_v27  ;;  %v3875_v59 = vadd.f32 %v3862_v7, %v971_v34  ;;  %v1024_v58 = vmul.f32 0.5, %v962_v47 }
 0x2b3   : > { %v2500_v31 = vpop.f32.mrf.mxu1 }
 0x2b4   : > { %2811 = verf.f32 %v1043_v43  ;;  %v1042_v33 = vmul.f32 0.70710677, %v3875_v59  ;;  %v3879_v37 = vadd.f32 %v2500_v31, %v3862_v7 }
 0x2b5   : > { %v2800_v39 = vpop.eup %2799  ;;  %v981_v35 = vpop.f32.mrf.mxu1 }
 0x2b6   : > { %v1069_v50 = vadd.f32 1.0, %v2800_v39  ;;  %2813 = verf.f32 %v1042_v33  ;;  %v1045_v18 = vmul.f32 0.70710677, %v3879_v37  ;;  %v3883_v52 = vadd.f32 %v3862_v7, %v981_v35 }
 0x2b7   : > { %v2802_v48 = vpop.eup %2801  ;;  %v2503_v51 = vpop.f32.mrf.mxu1  ;;  %v1027_v35 = vmul.f32 0.5, %v3871_v27 }
 0x2b8   : > { %v3885_v53 = vmul.f32 %v1069_v50, %v1021_v40  ;;  %v1068_v22 = vadd.f32 1.0, %v2802_v48  ;;  %2815 = verf.f32 %v1045_v18  ;;  %v3888_v54 = vadd.f32 %v2503_v51, %v3862_v7 }
 0x2b9   : > { %v2804_v57 = vpop.eup %2803  ;;  %v1044_v61 = vmul.f32 0.70710677, %v3883_v52  ;;  %v991_v63 = vpop.f32.mrf.mxu1 }
 0x2ba   : > { %1279 = vst [vmem:[#allocation2 + $0x30] sm:$0xff] %v3885_v53  ;;  %v3892_v25 = vmul.f32 %v1068_v22, %v1020_v49  ;;  %v1071_v0 = vadd.f32 1.0, %v2804_v57  ;;  %v1047_v29 = vmul.f32 0.70710677, %v3888_v54  ;;  %v3896_v16 = vadd.f32 %v3862_v7, %v991_v63 }
 0x2bb   : > { %v2806_v42 = vpop.eup %2805  ;;  %2817 = verf.f32 %v1044_v61  ;;  %v1026_v49 = vmul.f32 0.5, %v3875_v59 }
 0x2bc   : > { %1278 = vst [vmem:[#allocation2 + $0x28] sm:$0xff] %v3892_v25  ;;  %v3899_v46 = vmul.f32 %v1071_v0, %v1023_v14  ;;  %v1070_v9 = vadd.f32 1.0, %v2806_v42  ;;  %2819 = verf.f32 %v1047_v29  ;;  %v2506_v11 = vpop.f32.mrf.mxu1  ;;  %v1046_v13 = vmul.f32 0.70710677, %v3896_v16 }
 0x2bd   : > { %v2808_v12 = vpop.eup %2807  ;;  %v3903_v15 = vadd.f32 %v2506_v11, %v3862_v7  ;;  %v1029_v14 = vmul.f32 0.5, %v3879_v37 }
 0x2be   : > { %1281 = vst [vmem:[#allocation2 + $0x50] sm:$0xff] %v3899_v46  ;;  %v3906_v56 = vmul.f32 %v1070_v9, %v1022_v8  ;;  %v1073_v19 = vadd.f32 1.0, %v2808_v12  ;;  %v1001_v23 = vpop.f32.mrf.mxu1  ;;  %2821 = verf.f32 %v1046_v13 }
 0x2bf   : > { %v2810_v24 = vpop.eup %2809  ;;  %v1049_v10 = vmul.f32 0.70710677, %v3903_v15  ;;  %v3910_v28 = vadd.f32 %v3862_v7, %v1001_v23  ;;  %v2544_v36 = vpop.f32.mrf.mxu0 }
 0x2c0   : > { %1280 = vst [vmem:[#allocation2 + $0x48] sm:$0xff] %v3906_v56  ;;  %v3913_v21 = vmul.f32 %v1073_v19, %v1025_v17  ;;  %v1072_v34 = vadd.f32 1.0, %v2810_v24  ;;  %v3916_v43 = vadd.f32 %v2544_v36, %v3862_v7  ;;  %v1028_v17 = vmul.f32 0.5, %v3883_v52 }
 0x2c1   : > { %v2812_v26 = vpop.eup %2811  ;;  %2823 = verf.f32 %v1049_v10  ;;  %v1048_v31 = vmul.f32 0.70710677, %v3910_v28  ;;  %v1218_v33 = vpop.f32.mrf.mxu0  ;;  %v1031_v24 = vmul.f32 0.5, %v3888_v54 }
 0x2c2   : > { %1283 = vst [vmem:[#allocation2 + $0x70] sm:$0xff] %v3913_v21  ;;  %v3920_v39 = vmul.f32 %v1072_v34, %v1024_v58  ;;  %v1075_v40 = vadd.f32 1.0, %v2812_v26  ;;  %v1242_v50 = vmul.f32 0.70710677, %v3916_v43  ;;  %v1219_v47 = vadd.f32 %v3862_v7, %v1218_v33 }
 0x2c3   : > { %v2814_v18 = vpop.eup %2813  ;;  %2825 = verf.f32 %v1048_v31  ;;  %v1030_v33 = vmul.f32 0.5, %v3896_v16  ;;  %v1238_v16 = vmul.f32 0.5, %v3916_v43 }
 0x2c4   : > { %1282 = vst [vmem:[#allocation2 + $0x68] sm:$0xff] %v3920_v39  ;;  %v3926_v48 = vmul.f32 %v1075_v40, %v1027_v35  ;;  %v1074_v51 = vadd.f32 1.0, %v2814_v18  ;;  %2827 = verf.f32 %v1242_v50  ;;  %v2509_v22 = vpop.f32.mrf.mxu1  ;;  %v1241_v61 = vmul.f32 0.70710677, %v1219_v47 }
 0x2c5   : > { %v2816_v57 = vpop.eup %2815  ;;  %v1017_v27 = vadd.f32 %v2509_v22, %v3862_v7  ;;  %v1032_v22 = vmul.f32 0.5, %v3910_v28 }
 0x2c6   : > { %1285 = vst [vmem:[#allocation2 + $0x90] sm:$0xff] %v3926_v48  ;;  %v3931_v63 = vmul.f32 %v1074_v51, %v1026_v49  ;;  %v1077_v0 = vadd.f32 1.0, %v2816_v57  ;;  %v1011_v29 = vpop.f32.mrf.mxu1  ;;  %2829 = verf.f32 %v1241_v61 }
 0x2c7   : > { %v1051_v42 = vmul.f32 0.70710677, %v1017_v27  ;;  %v1012_v8 = vadd.f32 %v3862_v7, %v1011_v29  ;;  %v2547_v59 = vpop.f32.mrf.mxu0 }
 0x2c8   : > { %v2818_v9 = vpop.eup %2817  ;;  %1284 = vst [vmem:[#allocation2 + $0x88] sm:$0xff] %v3931_v63  ;;  %v3936_v11 = vmul.f32 %v1077_v0, %v1029_v14  ;;  %v1234_v12 = vadd.f32 %v2547_v59, %v3862_v7 }
 0x2c9   : > { %v2820_v13 = vpop.eup %2819  ;;  %v1076_v19 = vadd.f32 1.0, %v2818_v9  ;;  %2831 = verf.f32 %v1051_v42  ;;  %v1050_v37 = vmul.f32 0.70710677, %v1012_v8  ;;  %v1228_v23 = vpop.f32.mrf.mxu0 }
 0x2ca   : > { %1287 = vst [vmem:[#allocation2 + $0xb0] sm:$0xff] %v3936_v11  ;;  %v1079_v10 = vadd.f32 1.0, %v2820_v13  ;;  %v1244_v36 = vmul.f32 0.70710677, %v1234_v12  ;;  %v1229_v58 = vadd.f32 %v3862_v7, %v1228_v23  ;;  %v1033_v7 = vmul.f32 0.5, %v3903_v15 }
 0x2cb   : > { %v3943_v34 = vmul.f32 %v1076_v19, %v1028_v17  ;;  %2833 = verf.f32 %v1050_v37  ;;  %v2822_v26 = vpop.eup %2821  ;;  %v1237_v15 = vmul.f32 0.5, %v1219_v47  ;;  %v1035_v13 = vmul.f32 0.5, %v1017_v27 }
 0x2cc   : > { %v3945_v31 = vmul.f32 %v1079_v10, %v1031_v24  ;;  %2835 = verf.f32 %v1244_v36  ;;  %v1243_v52 = vmul.f32 0.70710677, %v1229_v58  ;;  %v1078_v35 = vadd.f32 1.0, %v2822_v26 }
 0x2cd   : > { %1286 = vst [vmem:[#allocation2 + $0xa8] sm:$0xff] %v3943_v34  ;;  %v1034_v37 = vmul.f32 0.5, %v1012_v8  ;;  %v1240_v24 = vmul.f32 0.5, %v1234_v12 }
 0x2ce   : > { %v2824_v40 = vpop.eup %2823  ;;  %1289 = vst [vmem:[#allocation2 + $0xd0] sm:$0xff] %v3945_v31  ;;  %2837 = verf.f32 %v1243_v52  ;;  %v3950_v54 = vmul.f32 %v1078_v35, %v1030_v33  ;;  %v1239_v52 = vmul.f32 0.5, %v1229_v58 }
 0x2cf   : > { %v1081_v50 = vadd.f32 1.0, %v2824_v40 }
 0x2d0   : > { %v2826_v18 = vpop.eup %2825  ;;  %1288 = vst [vmem:[#allocation2 + $0xc8] sm:$0xff] %v3950_v54 }
 0x2d1   : > { %v2828_v49 = vpop.eup %2827  ;;  %v3954_v51 = vmul.f32 %v1081_v50, %v1033_v7  ;;  %v1080_v57 = vadd.f32 1.0, %v2826_v18 }
 0x2d2   : > { %v1250_v61 = vadd.f32 1.0, %v2828_v49 }
 0x2d3   : > { %1291 = vst [vmem:[#allocation2 + $0xf0] sm:$0xff] %v3954_v51  ;;  %v3959_v14 = vmul.f32 %v1080_v57, %v1032_v22  ;;  %v2830_v0 = vpop.eup %2829 }
 0x2d4   : > { %v1254_v29 = vmul.f32 %v1250_v61, %v1238_v16  ;;  %v1249_v42 = vadd.f32 1.0, %v2830_v0 }
 0x2d5   : > { %1290 = vst [vmem:[#allocation2 + $0xe8] sm:$0xff] %v3959_v14 }
 0x2d6   : > { %v2832_v59 = vpop.eup %2831  ;;  %1295 = vst [vmem:[#allocation2 + $0x10] sm:$0xff] %v1254_v29  ;;  %v1253_v9 = vmul.f32 %v1249_v42, %v1237_v15 }
 0x2d7   : > { %v1083_v17 = vadd.f32 1.0, %v2832_v59 }
 0x2d8   : > { %v2834_v28 = vpop.eup %2833  ;;  %1294 = vst [vmem:[#allocation2 + $0x8] sm:$0xff] %v1253_v9 }
 0x2d9   : > { %v2836_v19 = vpop.eup %2835  ;;  %v3962_v43 = vmul.f32 %v1083_v17, %v1035_v13  ;;  %v1082_v23 = vadd.f32 1.0, %v2834_v28 }
 0x2da   : > { %v1252_v10 = vadd.f32 1.0, %v2836_v19 }
 0x2db   : > { %v2838_v36 = vpop.eup %2837  ;;  %1293 = vst [vmem:[#allocation2 + $0x110] sm:$0xff] %v3962_v43  ;;  %v3965_v47 = vmul.f32 %v1082_v23, %v1034_v37 }
 0x2dc   : > { %v1256_v26 = vmul.f32 %v1252_v10, %v1240_v24  ;;  %v1251_v33 = vadd.f32 1.0, %v2838_v36  ;;  %1302 = sbr.rel (%p2259_p5) target bundleno = 739 (0x2e3), region = 84 }
 0x2dd   : > { %1292 = vst [vmem:[#allocation2 + $0x108] sm:$0xff] %v3965_v47 }
 0x2de   : > { %1298 = vst [vmem:[#allocation2 + $0x130] sm:$0xff] %v1256_v26  ;;  %v1255_v27 = vmul.f32 %v1251_v33, %v1239_v52 }
 0x2e0   : > { %1297 = vst [vmem:[#allocation2 + $0x128] sm:$0xff] %v1255_v27 }
 0x2e1   : > { %v3178_v8 = vmov 0.0  }
 0x2e2   : > { %1303 = vst [vmem:[#allocation2 + $0x8] sm:$0xff] %v3178_v8  ;;  %1304 = vst [vmem:[#allocation2 + $0x10] sm:$0xff] %v3178_v8 }
 0x2e3 PF: > { %s4594_s12 = sld [smem:[#allocation24_spill]] }
 0x2e9   : > { %p2260_p11 = scmp.ne.s32.totalorder %s4594_s12, 1 }
 0x2eb   : > { %1308 = sbr.rel (%p2260_p11) target bundleno = 754 (0x2f2), region = 88 }
 0x2f0   : > { %v3179_v12 = vmov 0.0  }
 0x2f1   : > { %1309 = vst [vmem:[#allocation2 + $0x128] sm:$0xff] %v3179_v12  ;;  %1310 = vst [vmem:[#allocation2 + $0x130] sm:$0xff] %v3179_v12 }
 0x2f2 PF: > { %v1875_v58 = vld [vmem:[#allocation11 + $0x78] sm:$0xff]  ;;  %v1874_v35 = vld [vmem:[#allocation11 + $0x70] sm:$0xff]  ;;  %v1873_v40 = vld [vmem:[#allocation11 + $0x68] sm:$0xff]  ;;  %s4595_s3 = sld [smem:[#allocation50_spill]]  ;;  %s2077_s23 = sshll.u32 %s3970_s24, 4  ;;  %s4432_s23 = int_to_ptr.vmem [resolvable:$true] %s2077_s23 }
 0x2f3   : > { %2548 = vmatprep.subr.mxu1 %v1875_v58  ;;  %v1872_v7 = vld [vmem:[#allocation11 + $0x60] sm:$0xff]  ;;  %v1871_v50 = vld [vmem:[#allocation11 + $0x58] sm:$0xff]  ;;  %v3974_v18 = vld [vmem:[#allocation9 + $0x4] ss:$0 sm:$0xff]  ;;  %s4596_s27 = sld [smem:[#allocation53_spill]]  ;;  %s2061_s12 = scalar_lea.sflag [#allocation5], %s3464_s2 }
 0x2f4   : > { %2549 = vmatpush3.msra.mxu1 %v1875_v58  ;;  %v1870_v22 = vld [vmem:[#allocation11 + $0x50] sm:$0xff]  ;;  %v1316_v57 = vmul.f32 %v3974_v18, %v3892_v25  ;;  %v1408_v0 = vld [vmem:[#allocation2 + $0x8] sm:$0xff]  ;;  %v1317_v29 = vmul.f32 %v3974_v18, %v3885_v53  ;;  %v1318_v15 = vmul.f32 %v3974_v18, %v3906_v56  ;;  %v1869_v25 = vld [vmem:[#allocation11 + $0x48] sm:$0xff]  ;;  %v1319_v56 = vmul.f32 %v3974_v18, %v3899_v46  ;;  %s4605_s7 = sld [smem:[#allocation24_spill]]  ;;  %s3031_s10 = scalar_lea.vmem %s4432_s23, 2048 }
 0x2f5   : > { %2550 = vmatprep.subr.mxu1 %v1874_v35  ;;  %v1355_v16 = vld [vmem:[#allocation2 + $0x7] sm:$0xff]  ;;  %v3983_v61 = vld [vmem:[#allocation9] ss:$0 sm:$0xff]  ;;  %v3990_v59 = vld [vmem:[#allocation9 + $0x1] ss:$0 sm:$0xff]  ;;  %v4010_v52 = vmul.f32 %v3974_v18, %v3920_v39  ;;  %v4014_v33 = vmul.f32 %v3974_v18, %v3913_v21  ;;  %s4607_s13 = sld [smem:[#allocation25_spill]]  ;;  %p3032_p1 = scmp.ne.s32.totalorder %s4432_s23, %s3031_s10 }
 0x2f6   : > { %2551 = vmatpush3.msra.mxu1 %v1874_v35  ;;  %v1376_v42 = vmul.f32 %v3983_v61, %v1355_v16  ;;  %v1461_v9 = vld [vmem:[#allocation2 + $0x9] sm:$0xff]  ;;  %v3992_v13 = vld [vmem:[#allocation9 + $0x2] ss:$0 sm:$0xff]  ;;  %v1429_v28 = vmul.f32 %v3990_v59, %v1408_v0  ;;  %v3996_v37 = vld [vmem:[#allocation9 + $0x3] ss:$0 sm:$0xff]  ;;  %s4611_s30 = sld [smem:[#allocation29_spill]] }
 0x2f7   : > { %2552 = vmatprep.subr.mxu1 %v1873_v40  ;;  %v1514_v19 = vld [vmem:[#allocation2 + $0x27] sm:$0xff]  ;;  %v4000_v23 = vld [vmem:[#allocation9 + $0x5] ss:$0 sm:$0xff]  ;;  %v4004_v10 = vld [vmem:[#allocation9 + $0x6] ss:$0 sm:$0xff]  ;;  %v1482_v8 = vmul.f32 %v3992_v13, %v1461_v9  ;;  %s4614_s16 = sld [smem:[#allocation54_spill]] }
 0x2f8   : > { %v3979_v49 = vld [vmem:[%s4595_s3] ss:$0 sm:$0xff]  ;;  %2553 = vmatpush3.msra.mxu1 %v1873_v40  ;;  %v1567_v53 = vld [vmem:[#allocation2 + $0x29] sm:$0xff]  ;;  %v1378_v26 = vmul.f32 %v3983_v61, %v1514_v19  ;;  %v1535_v12 = vmul.f32 %v3996_v37, %v1514_v19  ;;  %v4020_v35 = vld [vmem:[#allocation9 + $0x7] ss:$0 sm:$0xff]  ;;  %s3180_s0 = smov [#allocation14]  }
 0x2f9   : > { %2554 = vmatprep.subr.mxu1 %v1872_v7  ;;  %v1339_v17 = vadd.f32 %v3979_v49, %v1316_v57  ;;  %v4002_v24 = vld [vmem:[#allocation2 + $0x47] sm:$0xff]  ;;  %v1341_v36 = vadd.f32 %v3979_v49, %v1318_v15  ;;  %v1868_v46 = vld [vmem:[#allocation11 + $0x40] sm:$0xff]  ;;  %v1340_v39 = vadd.f32 %v3979_v49, %v1317_v29  ;;  %v1484_v0 = vmul.f32 %v3992_v13, %v1567_v53  ;;  %s3035_s3 = sshll.u32 %s3180_s0, 4  ;;  %s3036_s3 = int_to_ptr.vmem [resolvable:$false] %s3035_s3 }
 0x2fa   : > { %2555 = vmatpush3.msra.mxu1 %v1872_v7  ;;  %v4018_v58 = vld [vmem:[#allocation2 + $0x48] sm:$0xff]  ;;  %v1588_v7 = vmul.f32 %v4000_v23, %v1567_v53  ;;  %v1642_v21 = vmul.f32 %v4004_v10, %v4002_v24  ;;  %v1409_v16 = vld [vmem:[#allocation2 + $0x10] sm:$0xff]  ;;  %v1537_v15 = vmul.f32 %v3996_v37, %v4002_v24  ;;  %v1342_v55 = vadd.f32 %v3979_v49, %v1319_v56  ;;  %s2281_s20 = sshll.u32 %s4605_s7, 4  ;;  %s3037_s21 = scalar_lea.vmem %s3036_s3, 4096 }
 0x2fb   : > { %2556 = vmatprep.subr.mxu1 %v1871_v50  ;;  %v1392_v27 = vadd.f32 %v1376_v42, %v1339_v17  ;;  %v4022_v40 = vld [vmem:[#allocation2 + $0x49] sm:$0xff]  ;;  %v1430_v29 = vmul.f32 %v3990_v59, %v1409_v16  ;;  %v1462_v17 = vld [vmem:[#allocation2 + $0x11] sm:$0xff]  ;;  %v1695_v5 = vmul.f32 %v4020_v35, %v4018_v58  ;;  %v1394_v4 = vadd.f32 %v1378_v26, %v1341_v36  ;;  %s2275_s22 = sshll.u32 %s4607_s13, 5  ;;  %p3038_p9 = scmp.lt.s32.totalorder %s4432_s23, %s3036_s3 }
 0x2fc   : > { %2557 = vmatpush3.msra.mxu1 %v1871_v50  ;;  %v4028_v50 = vld [vmem:[#allocation9 + $0x8] ss:$0 sm:$0xff]  ;;  %v1356_v57 = vld [vmem:[#allocation2 + $0xf] sm:$0xff]  ;;  %v4040_v53 = vmul.f32 %v4000_v23, %v4022_v40  ;;  %v1483_v56 = vmul.f32 %v3992_v13, %v1462_v17  ;;  %s2074_s6 = sadd.s32 %s2281_s20, %s2275_s22  ;;  %p4616_p0 = scmp.ne.s32.totalorder %s4611_s30, 0 }
 0x2fd   : > { %2558 = vmatprep.subr.mxu1 %v1870_v22  ;;  %v1445_v42 = vadd.f32 %v1429_v28, %v1392_v27  ;;  %v1377_v9 = vmul.f32 %v3983_v61, %v1356_v57  ;;  %v1515_v19 = vld [vmem:[#allocation2 + $0x2f] sm:$0xff]  ;;  %v4045_v57 = vmul.f32 %v4028_v50, %v4022_v40  ;;  %v4065_v30 = vld [vmem:[#allocation2 + $0x67] sm:$0xff]  ;;  %s2276_s29 = sshll.u32 %s2074_s6, 7  ;;  %s4615_s28 = smov %s4614_s16 }
 0x2fe   : > { %2559 = vmatpush3.msra.mxu1 %v1870_v22  ;;  %v1568_v6 = vld [vmem:[#allocation2 + $0x31] sm:$0xff]  ;;  %v1379_v22 = vmul.f32 %v3983_v61, %v1515_v19  ;;  %v1867_v28 = vld [vmem:[#allocation11 + $0x38] sm:$0xff]  ;;  %v1536_v36 = vmul.f32 %v3996_v37, %v1515_v19  ;;  %s4430_s17 = scalar_lea.hbm %s4614_s16, %s2276_s29  ;;  %p3033_p10 = pnand %p3032_p1, %p4616_p0 }
 0x2ff   : > { %2560 = vmatprep.subr.mxu1 %v1869_v25  ;;  %v1498_v27 = vadd.f32 %v1482_v8, %v1445_v42  ;;  %v1393_v16 = vadd.f32 %v1377_v9, %v1340_v39  ;;  %v4048_v3 = vld [vmem:[#allocation2 + $0x4f] sm:$0xff]  ;;  %v1589_v26 = vmul.f32 %v4000_v23, %v1568_v6  ;;  %v1866_v39 = vld [vmem:[#allocation11 + $0x30] sm:$0xff]  ;;  %p3039_p3 = scmp.lt.s32.totalorder %s3037_s21, %s3031_s10 }
 0x300   : > { %2561 = vmatpush3.msra.mxu1 %v1869_v25  ;;  %v1410_v2 = vld [vmem:[#allocation2 + $0x28] sm:$0xff]  ;;  %v1643_v25 = vmul.f32 %v4004_v10, %v4048_v3  ;;  %v4054_v20 = vld [vmem:[#allocation2 + $0x50] sm:$0xff]  ;;  %v1395_v19 = vadd.f32 %v1379_v22, %v1342_v55  ;;  %v1644_v55 = vmul.f32 %v4004_v10, %v4065_v30  ;;  %p3034_p12 = pneg %p3033_p10 }
 0x301   : > { %2562 = vmatprep.subr.mxu1 %v1868_v46  ;;  %v1431_v8 = vmul.f32 %v3990_v59, %v1410_v2  ;;  %v1411_v42 = vld [vmem:[#allocation2 + $0x30] sm:$0xff]  ;;  %v1551_v9 = vadd.f32 %v1535_v12, %v1498_v27  ;;  %v1446_v17 = vadd.f32 %v1430_v29, %v1393_v16  ;;  %v1696_v1 = vmul.f32 %v4020_v35, %v4054_v20  ;;  %v4067_v2 = vld [vmem:[#allocation2 + $0x68] sm:$0xff]  ;;  %v1865_v29 = vld [vmem:[#allocation11 + $0x28] sm:$0xff]  ;;  %p3040_p6 = por %p3039_p3, %p3038_p9 }
 0x302   : > { %2563 = vmatpush3.msra.mxu1 %v1868_v46  ;;  %v4059_v60 = vld [vmem:[#allocation2 + $0x51] sm:$0xff]  ;;  %v1432_v46 = vmul.f32 %v3990_v59, %v1411_v42  ;;  %v1485_v12 = vmul.f32 %v3992_v13, %v1568_v6  ;;  %v1697_v22 = vmul.f32 %v4020_v35, %v4067_v2  ;;  %v4075_v41 = vld [vmem:[#allocation2 + $0x69] sm:$0xff]  ;;  %v1538_v6 = vmul.f32 %v3996_v37, %v4048_v3 }
 0x303   : > { %2564 = vmatprep.subr.mxu1 %v1867_v28  ;;  %v4063_v44 = vmul.f32 %v4028_v50, %v4059_v60  ;;  %v1447_v32 = vadd.f32 %v1431_v8, %v1394_v4  ;;  %v1604_v27 = vadd.f32 %v1588_v7, %v1551_v9  ;;  %v1499_v16 = vadd.f32 %v1483_v56, %v1446_v17  ;;  %v1864_v7 = vld [vmem:[#allocation11 + $0x20] sm:$0xff]  ;;  %p3041_p4 = pnand %p3040_p6, %p3034_p12 }
 0x304   : > { %2565 = vmatpush3.msra.mxu1 %v1867_v28  ;;  %v1750_v8 = vmul.f32 %v4028_v50, %v4075_v41  ;;  %v1448_v42 = vadd.f32 %v1432_v46, %v1395_v19  ;;  %v1343_v9 = vadd.f32 %v3979_v49, %v4010_v52  ;;  %v1380_v17 = vmul.f32 %v3983_v61, %v4002_v24 }
 0x305   : > { %2566 = vmatprep.subr.mxu1 %v1866_v39  ;;  %v1500_v4 = vadd.f32 %v1484_v0, %v1447_v32  ;;  %v1658_v28 = vadd.f32 %v1642_v21, %v1604_v27  ;;  %v1552_v56 = vadd.f32 %v1536_v36, %v1499_v16  ;;  %v1591_v0 = vmul.f32 %v4000_v23, %v4059_v60  ;;  %v4089_v36 = vld [vmem:[#allocation2 + $0x6f] sm:$0xff] }
 0x306   : > { %2567 = vmatpush3.msra.mxu1 %v1866_v39  ;;  %v1501_v32 = vadd.f32 %v1485_v12, %v1448_v42  ;;  %v1433_v19 = vmul.f32 %v3990_v59, %v4018_v58  ;;  %v1863_v39 = vld [vmem:[#allocation11 + $0x18] sm:$0xff]  ;;  %v4091_v27 = vld [vmem:[#allocation2 + $0x70] sm:$0xff]  ;;  %v1396_v52 = vadd.f32 %v1380_v17, %v1343_v9  ;;  %v1486_v24 = vmul.f32 %v3992_v13, %v4022_v40 }
 0x307   : > { %2568 = vmatprep.subr.mxu1 %v1865_v29  ;;  %v1553_v62 = vadd.f32 %v1537_v15, %v1500_v4  ;;  %v1711_v46 = vadd.f32 %v1695_v5, %v1658_v28  ;;  %v1605_v21 = vadd.f32 %v1589_v26, %v1552_v56  ;;  %v1645_v16 = vmul.f32 %v4004_v10, %v4089_v36  ;;  %v1862_v5 = vld [vmem:[#allocation11 + $0x10] sm:$0xff]  ;;  %v4101_v4 = vld [vmem:[#allocation2 + $0x71] sm:$0xff] }
 0x308   : > { %2569 = vmatpush3.msra.mxu1 %v1865_v29  ;;  %v1554_v12 = vadd.f32 %v1538_v6, %v1501_v32  ;;  %v1698_v58 = vmul.f32 %v4020_v35, %v4091_v27  ;;  %v1449_v42 = vadd.f32 %v1433_v19, %v1396_v52  ;;  %v1539_v40 = vmul.f32 %v3996_v37, %v4065_v30  ;;  %v4111_v19 = vld [vmem:[#allocation2 + $0x87] sm:$0xff] }
 0x309   : > { %2570 = vmatprep.subr.mxu1 %v1864_v7  ;;  %v1606_v15 = vadd.f32 %v4040_v53, %v1553_v62  ;;  %v1764_v26 = vadd.f32 %v4045_v57, %v1711_v46  ;;  %v1659_v29 = vadd.f32 %v1643_v25, %v1605_v21  ;;  %v1751_v6 = vmul.f32 %v4028_v50, %v4101_v4  ;;  %v4120_v52 = vld [vmem:[#allocation2 + $0x88] sm:$0xff] }
 0x30a   : > { %2571 = vmatpush3.msra.mxu1 %v1864_v7  ;;  %v1607_v53 = vadd.f32 %v1591_v0, %v1554_v12  ;;  %v1344_v28 = vadd.f32 %v3979_v49, %v4014_v33  ;;  %v1861_v7 = vld [vmem:[#allocation11 + $0x8] sm:$0xff]  ;;  %v1502_v25 = vadd.f32 %v1486_v24, %v1449_v42  ;;  %v1592_v9 = vmul.f32 %v4000_v23, %v4075_v41  ;;  %v1860_v33 = vld [vmem:[#allocation11] sm:$0xff] }
 0x30b   : > { %2572 = vmatprep.subr.mxu1 %v1863_v39  ;;  %v1660_v62 = vadd.f32 %v1644_v55, %v1606_v15  ;;  %v1796_v56 = vmul.f32 0.70710677, %v1764_v26  ;;  %v1712_v57 = vadd.f32 %v1696_v1, %v1659_v29  ;;  %v1381_v55 = vmul.f32 %v3983_v61, %v4048_v3 }
 0x30c   : > { %2573 = vmatpush3.msra.mxu1 %v1863_v39  ;;  %v1661_v32 = vadd.f32 %v1645_v16, %v1607_v53  ;;  %v1434_v0 = vmul.f32 %v3990_v59, %v4054_v20  ;;  %v1555_v39 = vadd.f32 %v1539_v40, %v1502_v25  ;;  %v1646_v46 = vmul.f32 %v4004_v10, %v4111_v19 }
 0x30d   : > { %2574 = vmatprep.subr.mxu1 %v1862_v5  ;;  %v1713_v17 = vadd.f32 %v1697_v22, %v1660_v62  ;;  %2839 = verf.f32 %v1796_v56  ;;  %v1765_v1 = vadd.f32 %v4063_v44, %v1712_v57  ;;  %v1397_v24 = vadd.f32 %v1381_v55, %v1344_v28  ;;  %v4136_v28 = vld [vmem:[#allocation2 + $0x8f] sm:$0xff] }
 0x30e   : > { %2575 = vmatpush3.msra.mxu1 %v1862_v5  ;;  %v1714_v21 = vadd.f32 %v1698_v58, %v1661_v32  ;;  %v1487_v3 = vmul.f32 %v3992_v13, %v4059_v60  ;;  %v1608_v15 = vadd.f32 %v1592_v9, %v1555_v39  ;;  %v1699_v12 = vmul.f32 %v4020_v35, %v4120_v52  ;;  %v4145_v55 = vld [vmem:[#allocation2 + $0x90] sm:$0xff] }
 0x30f   : > { %2576 = vmatprep.subr.mxu1 %v1861_v7  ;;  %v1766_v22 = vadd.f32 %v1750_v8, %v1713_v17  ;;  %v1797_v20 = vmul.f32 0.70710677, %v1765_v1  ;;  %v1322_v44 = vmul.f32 %v3974_v18, %v3931_v63  ;;  %v4128_v8 = vld [vmem:[#allocation2 + $0x89] sm:$0xff]  ;;  %v1450_v58 = vadd.f32 %v1434_v0, %v1397_v24  ;;  %v4153_v24 = vld [vmem:[#allocation2 + $0x91] sm:$0xff] }
 0x310   : > { %2577 = vmatpush3.msra.mxu1 %v1861_v7  ;;  %v1767_v5 = vadd.f32 %v1751_v6, %v1714_v21  ;;  %v1540_v29 = vmul.f32 %v3996_v37, %v4089_v36  ;;  %v1662_v60 = vadd.f32 %v1646_v46, %v1608_v15  ;;  %v1752_v42 = vmul.f32 %v4028_v50, %v4128_v8 }
 0x311   : > { %2578 = vmatprep.subr.mxu1 %v1860_v33  ;;  %v1798_v16 = vmul.f32 0.70710677, %v1766_v22  ;;  %2841 = verf.f32 %v1797_v20  ;;  %v1503_v62 = vadd.f32 %v1487_v3, %v1450_v58  ;;  %v1593_v63 = vmul.f32 %v4000_v23, %v4101_v4 }
 0x312   : > { %2579 = vmatpush3.msra.mxu1 %v1860_v33  ;;  %v1799_v40 = vmul.f32 0.70710677, %v1767_v5  ;;  %v1780_v53 = vmul.f32 0.5, %v1764_v26  ;;  %v1715_v6 = vadd.f32 %v1699_v12, %v1662_v60  ;;  %v1345_v7 = vadd.f32 %v3979_v49, %v1322_v44  ;;  %v4165_v44 = vld [vmem:[#allocation2 + $0xa7] sm:$0xff] }
 0x313   : > { %2843 = verf.f32 %v1798_v16  ;;  %v1382_v56 = vmul.f32 %v3983_v61, %v4065_v30  ;;  %v1556_v57 = vadd.f32 %v1540_v29, %v1503_v62  ;;  %v1647_v25 = vmul.f32 %v4004_v10, %v4136_v28  ;;  %v4167_v16 = vld [vmem:[#allocation2 + $0xa8] sm:$0xff] }
 0x314   : > { %2845 = verf.f32 %v1799_v40  ;;  %v1435_v9 = vmul.f32 %v3990_v59, %v4067_v2  ;;  %v1781_v17 = vmul.f32 0.5, %v1765_v1  ;;  %v1768_v32 = vadd.f32 %v1752_v42, %v1715_v6 }
 0x315   : > { %v1398_v26 = vadd.f32 %v1382_v56, %v1345_v7  ;;  %v1488_v0 = vmul.f32 %v3992_v13, %v4075_v41  ;;  %v1782_v33 = vmul.f32 0.5, %v1766_v22  ;;  %v4149_v39 = vmul.f32 0.5, %v1767_v5  ;;  %v4169_v5 = vld [vmem:[#allocation2 + $0xa9] sm:$0xff] }
 0x316   : > { %v1609_v30 = vadd.f32 %v1593_v63, %v1556_v57  ;;  %v1700_v46 = vmul.f32 %v4020_v35, %v4145_v55  ;;  %v1800_v21 = vmul.f32 0.70710677, %v1768_v32  ;;  %v1541_v2 = vmul.f32 %v3996_v37, %v4111_v19 }
 0x317   : > { %v1451_v3 = vadd.f32 %v1435_v9, %v1398_v26  ;;  %v1323_v1 = vmul.f32 %v3974_v18, %v3926_v48  ;;  %v1753_v41 = vmul.f32 %v4028_v50, %v4153_v24  ;;  %v1594_v22 = vmul.f32 %v4000_v23, %v4128_v8 }
 0x318   : > { %v1663_v20 = vadd.f32 %v1647_v25, %v1609_v30  ;;  %v1383_v15 = vmul.f32 %v3983_v61, %v4089_v36  ;;  %2847 = verf.f32 %v1800_v21  ;;  %v1436_v58 = vmul.f32 %v3990_v59, %v4091_v27 }
 0x319   : > { %v1504_v12 = vadd.f32 %v1488_v0, %v1451_v3  ;;  %v1346_v48 = vadd.f32 %v3979_v49, %v1323_v1  ;;  %v1648_v42 = vmul.f32 %v4004_v10, %v4165_v44  ;;  %v1701_v36 = vmul.f32 %v4020_v35, %v4167_v16 }
 0x31a   : > { %v2840_v29 = vpop.eup %2839  ;;  %v1716_v60 = vadd.f32 %v1700_v46, %v1663_v20  ;;  %v1754_v40 = vmul.f32 %v4028_v50, %v4169_v5  ;;  %v1489_v7 = vmul.f32 %v3992_v13, %v4101_v4  ;;  %v4182_v56 = vmul.f32 0.5, %v1768_v32  ;;  %v4195_v32 = vld [vmem:[#allocation2 + $0xaf] sm:$0xff] }
 0x31b   : > { %v1828_v62 = vadd.f32 1.0, %v2840_v29  ;;  %v1557_v63 = vadd.f32 %v1541_v2, %v1504_v12  ;;  %v1399_v6 = vadd.f32 %v1383_v15, %v1346_v48  ;;  %v1324_v57 = vmul.f32 %v3974_v18, %v3943_v34 }
 0x31c   : > { %v4184_v27 = vadd.f32 %v1753_v41, %v1716_v60  ;;  %v1384_v25 = vmul.f32 %v3983_v61, %v4111_v19  ;;  %v1542_v30 = vmul.f32 %v3996_v37, %v4136_v28  ;;  %v1595_v4 = vmul.f32 %v4000_v23, %v4153_v24 }
 0x31d   : > { %v1844_v9 = vmul.f32 %v1828_v62, %v1780_v53  ;;  %v1610_v26 = vadd.f32 %v1594_v22, %v1557_v63  ;;  %v1452_v0 = vadd.f32 %v1436_v58, %v1399_v6  ;;  %v1347_v3 = vadd.f32 %v3979_v49, %v1324_v57  ;;  %v4202_v22 = vld [vmem:[#allocation2 + $0xb0] sm:$0xff] }
 0x31e   : > { %v2842_v46 = vpop.eup %2841  ;;  %v1801_v21 = vmul.f32 0.70710677, %v4184_v27  ;;  %v1437_v34 = vmul.f32 %v3990_v59, %v4120_v52  ;;  %v1649_v20 = vmul.f32 %v4004_v10, %v4195_v32  ;;  %v1490_v12 = vmul.f32 %v3992_v13, %v4128_v8 }
 0x31f   : > { %2580 = vmatprep.mubr.f32.mxu1 %v1844_v9  ;;  %v1829_v53 = vadd.f32 1.0, %v2842_v46  ;;  %v1664_v2 = vadd.f32 %v1648_v42, %v1610_v26  ;;  %v1505_v1 = vadd.f32 %v1489_v7, %v1452_v0  ;;  %v1400_v15 = vadd.f32 %v1384_v25, %v1347_v3  ;;  %v4210_v25 = vld [vmem:[#allocation2 + $0xb1] sm:$0xff] }
 0x320   : > { %v2844_v19 = vpop.eup %2843  ;;  %2849 = verf.f32 %v1801_v21  ;;  %v1702_v60 = vmul.f32 %v4020_v35, %v4202_v22  ;;  %v1543_v6 = vmul.f32 %v3996_v37, %v4165_v44  ;;  %v1325_v8 = vmul.f32 %v3974_v18, %v3936_v11 }
 0x321   : > { %v1830_v41 = vadd.f32 1.0, %v2844_v19  ;;  %v2846_v48 = vpop.eup %2845  ;;  %v1845_v58 = vmul.f32 %v1829_v53, %v1781_v17  ;;  %v1717_v29 = vadd.f32 %v1701_v36, %v1664_v2  ;;  %v1558_v52 = vadd.f32 %v1542_v30, %v1505_v1  ;;  %v4221_v30 = vld [vmem:[#allocation2 + $0xc7] sm:$0xff] }
 0x322   : > { %v1831_v62 = vadd.f32 1.0, %v2846_v48  ;;  %v1453_v63 = vadd.f32 %v1437_v34, %v1400_v15  ;;  %v1385_v17 = vmul.f32 %v3983_v61, %v4136_v28  ;;  %v1596_v26 = vmul.f32 %v4000_v23, %v4169_v5  ;;  %v4230_v19 = vld [vmem:[#allocation2 + $0xc8] sm:$0xff] }
 0x323   : > { %v1846_v42 = vmul.f32 %v1830_v41, %v1782_v33  ;;  %2581 = vmatmul.mubr.f32.vlgmr.msra.gmra.mxu1 %v1845_v58  ;;  %v1770_v7 = vadd.f32 %v1754_v40, %v1717_v29  ;;  %v1611_v57 = vadd.f32 %v1595_v4, %v1558_v52  ;;  %v1755_v33 = vmul.f32 %v4028_v50, %v4210_v25  ;;  %v4239_v15 = vld [vmem:[#allocation2 + $0xc9] sm:$0xff] }
 0x324   : > { %v1847_v36 = vmul.f32 %v1831_v62, %v4149_v39  ;;  %v1506_v9 = vadd.f32 %v1490_v12, %v1453_v63  ;;  %v1348_v46 = vadd.f32 %v3979_v49, %v1325_v8  ;;  %v1438_v11 = vmul.f32 %v3990_v59, %v4145_v55 }
 0x325   : > { %2583 = vmatprep.mubr.f32.mxu1 %v1846_v42  ;;  %v1802_v40 = vmul.f32 0.70710677, %v1770_v7  ;;  %v1665_v0 = vadd.f32 %v1649_v20, %v1611_v57  ;;  %v2848_v28 = vpop.eup %2847  ;;  %v1650_v39 = vmul.f32 %v4004_v10, %v4221_v30  ;;  %v1491_v4 = vmul.f32 %v3992_v13, %v4153_v24 }
 0x326   : > { %v1559_v21 = vadd.f32 %v1543_v6, %v1506_v9  ;;  %v1832_v3 = vadd.f32 1.0, %v2848_v28  ;;  %v1401_v53 = vadd.f32 %v1385_v17, %v1348_v46  ;;  %v1703_v1 = vmul.f32 %v4020_v35, %v4230_v19 }
 0x327   : > { %2584 = vmatmul.mubr.f32.gmra.mxu1 %v1847_v36  ;;  %2851 = verf.f32 %v1802_v40  ;;  %v1718_v34 = vadd.f32 %v1702_v60, %v1665_v0  ;;  %v1544_v55 = vmul.f32 %v3996_v37, %v4195_v32  ;;  %v1326_v20 = vmul.f32 %v3974_v18, %v3950_v54 }
 0x328   : > { %v1612_v2 = vadd.f32 %v1596_v26, %v1559_v21  ;;  %v1848_v41 = vmul.f32 %v1832_v3, %v4182_v56  ;;  %v1454_v12 = vadd.f32 %v1438_v11, %v1401_v53  ;;  %v1386_v48 = vmul.f32 %v3983_v61, %v4165_v44  ;;  %v4251_v44 = vld [vmem:[#allocation2 + $0xcf] sm:$0xff] }
 0x329   : > { %v1771_v24 = vadd.f32 %v1755_v33, %v1718_v34  ;;  %v1756_v29 = vmul.f32 %v4028_v50, %v4239_v15  ;;  %v1349_v52 = vadd.f32 %v3979_v49, %v1326_v20  ;;  %v1439_v60 = vmul.f32 %v3990_v59, %v4167_v16  ;;  %v4259_v26 = vld [vmem:[#allocation2 + $0xd0] sm:$0xff] }
 0x32a   : > { %v1666_v58 = vadd.f32 %v1650_v39, %v1612_v2  ;;  %2586 = vmatprep.mubr.f32.mxu1 %v1848_v41  ;;  %v1785_v54 = vmul.f32 0.5, %v4184_v27  ;;  %v1507_v42 = vadd.f32 %v1491_v4, %v1454_v12  ;;  %v1597_v62 = vmul.f32 %v4000_v23, %v4210_v25  ;;  %v4273_v2 = vld [vmem:[#allocation2 + $0xe7] sm:$0xff] }
 0x32b   : > { %v1803_v56 = vmul.f32 0.70710677, %v1771_v24  ;;  %v1786_v63 = vmul.f32 0.5, %v1770_v7  ;;  %v1402_v57 = vadd.f32 %v1386_v48, %v1349_v52  ;;  %v1492_v8 = vmul.f32 %v3992_v13, %v4169_v5  ;;  %v4261_v7 = vld [vmem:[#allocation2 + $0xd1] sm:$0xff]  ;;  %v4284_v12 = vld [vmem:[#allocation2 + $0xe9] sm:$0xff] }
 0x32c   : > { %v1719_v6 = vadd.f32 %v1703_v1, %v1666_v58  ;;  %v1560_v36 = vadd.f32 %v1544_v55, %v1507_v42  ;;  %v1651_v16 = vmul.f32 %v4004_v10, %v4251_v44  ;;  %v1545_v27 = vmul.f32 %v3996_v37, %v4221_v30 }
 0x32d   : > { %v2850_v17 = vpop.eup %2849  ;;  %2853 = verf.f32 %v1803_v56  ;;  %v1455_v40 = vadd.f32 %v1439_v60, %v1402_v57  ;;  %v1327_v0 = vmul.f32 %v3974_v18, %v3945_v31  ;;  %v1704_v46 = vmul.f32 %v4020_v35, %v4259_v26  ;;  %v4275_v31 = vld [vmem:[#allocation2 + $0xe8] sm:$0xff] }
 0x32e   : > { %v1833_v33 = vadd.f32 1.0, %v2850_v17  ;;  %v1772_v9 = vadd.f32 %v1756_v29, %v1719_v6  ;;  %v1613_v5 = vadd.f32 %v1597_v62, %v1560_v36  ;;  %v1757_v11 = vmul.f32 %v4028_v50, %v4261_v7  ;;  %v4299_v17 = vld [vmem:[#allocation2 + $0xef] sm:$0xff] }
 0x32f   : > { %v1387_v28 = vmul.f32 %v3983_v61, %v4195_v32  ;;  %v1508_v4 = vadd.f32 %v1492_v8, %v1455_v40  ;;  %v1598_v3 = vmul.f32 %v4000_v23, %v4239_v15  ;;  %v1787_v34 = vmul.f32 0.5, %v1771_v24  ;;  %v4305_v40 = vld [vmem:[#allocation2 + $0xf0] sm:$0xff] }
 0x330   : > { %v1849_v21 = vmul.f32 %v1833_v33, %v1785_v54  ;;  %v1804_v39 = vmul.f32 0.70710677, %v1772_v9  ;;  %v1667_v53 = vadd.f32 %v1651_v16, %v1613_v5  ;;  %v1350_v1 = vadd.f32 %v3979_v49, %v1327_v0 }
 0x331   : > { %v1440_v55 = vmul.f32 %v3990_v59, %v4202_v22  ;;  %v1561_v32 = vadd.f32 %v1545_v27, %v1508_v4  ;;  %v1652_v20 = vmul.f32 %v4004_v10, %v4273_v2  ;;  %v1705_v41 = vmul.f32 %v4020_v35, %v4275_v31 }
 0x332   : > { %2587 = vmatmul.mubr.f32.gmra.mxu1 %v1849_v21  ;;  %2855 = verf.f32 %v1804_v39  ;;  %v1720_v24 = vadd.f32 %v1704_v46, %v1667_v53  ;;  %v1403_v48 = vadd.f32 %v1387_v28, %v1350_v1  ;;  %v1493_v58 = vmul.f32 %v3992_v13, %v4210_v25 }
 0x333   : > { %v1328_v29 = vmul.f32 %v3974_v18, %v3959_v14  ;;  %v1614_v52 = vadd.f32 %v1598_v3, %v1561_v32  ;;  %v1758_v60 = vmul.f32 %v4028_v50, %v4284_v12  ;;  %v1546_v54 = vmul.f32 %v3996_v37, %v4251_v44 }
 0x334   : > { %v2852_v22 = vpop.eup %2851  ;;  %v1388_v56 = vmul.f32 %v3983_v61, %v4221_v30  ;;  %v1773_v62 = vadd.f32 %v1757_v11, %v1720_v24  ;;  %v1456_v6 = vadd.f32 %v1440_v55, %v1403_v48  ;;  %v1788_v25 = vmul.f32 0.5, %v1772_v9 }
 0x335   : > { %v1834_v42 = vadd.f32 1.0, %v2852_v22  ;;  %v1351_v57 = vadd.f32 %v3979_v49, %v1328_v29  ;;  %v1668_v8 = vadd.f32 %v1652_v20, %v1614_v52  ;;  %v1599_v14 = vmul.f32 %v4000_v23, %v4261_v7  ;;  %v1686_v29 = vld [vmem:[#allocation2 + $0x108] sm:$0xff] }
 0x336   : > { %v1441_v36 = vmul.f32 %v3990_v59, %v4230_v19  ;;  %v1805_v27 = vmul.f32 0.70710677, %v1773_v62  ;;  %v1509_v33 = vadd.f32 %v1493_v58, %v1456_v6  ;;  %v1653_v30 = vmul.f32 %v4004_v10, %v4299_v17  ;;  %v4311_v19 = vld [vmem:[#allocation2 + $0xf1] sm:$0xff] }
 0x337   : > { %v1850_v16 = vmul.f32 %v1834_v42, %v1786_v63  ;;  %v1721_v0 = vadd.f32 %v1705_v41, %v1668_v8  ;;  %v1706_v9 = vmul.f32 %v4020_v35, %v4305_v40  ;;  %v1404_v5 = vadd.f32 %v1388_v56, %v1351_v57  ;;  %v1633_v63 = vld [vmem:[#allocation2 + $0x107] sm:$0xff]  ;;  %v1634_v57 = vld [vmem:[#allocation2 + $0x10f] sm:$0xff] }
 0x338   : > { %v1494_v46 = vmul.f32 %v3992_v13, %v4239_v15  ;;  %2857 = verf.f32 %v1805_v27  ;;  %v1562_v11 = vadd.f32 %v1546_v54, %v1509_v33  ;;  %v1329_v28 = vmul.f32 %v3974_v18, %v3954_v51  ;;  %v1739_v27 = vld [vmem:[#allocation2 + $0x109] sm:$0xff] }
 0x339   : > { %2589 = vmatprep.mubr.f32.mxu1 %v1850_v16  ;;  %v1389_v21 = vmul.f32 %v3983_v61, %v4251_v44  ;;  %v4317_v4 = vadd.f32 %v1758_v60, %v1721_v0  ;;  %v1759_v3 = vmul.f32 %v4028_v50, %v4311_v19  ;;  %v1457_v53 = vadd.f32 %v1441_v36, %v1404_v5 }
 0x33a   : > { %v2854_v39 = vpop.eup %2853  ;;  %v1547_v15 = vmul.f32 %v3996_v37, %v4273_v2  ;;  %v1615_v55 = vadd.f32 %v1599_v14, %v1562_v11  ;;  %v1352_v32 = vadd.f32 %v3979_v49, %v1329_v28  ;;  %v1442_v51 = vmul.f32 %v3990_v59, %v4259_v26 }
 0x33b   : > { %v1835_v1 = vadd.f32 1.0, %v2854_v39  ;;  %v1806_v20 = vmul.f32 0.70710677, %v4317_v4  ;;  %v1510_v44 = vadd.f32 %v1494_v46, %v1457_v53  ;;  %v1600_v41 = vmul.f32 %v4000_v23, %v4284_v12 }
 0x33c   : > { %v1654_v24 = vmul.f32 %v4004_v10, %v1633_v63  ;;  %v1669_v58 = vadd.f32 %v1653_v30, %v1615_v55  ;;  %v1405_v22 = vadd.f32 %v1389_v21, %v1352_v32  ;;  %v1495_v52 = vmul.f32 %v3992_v13, %v4261_v7  ;;  %v1687_v30 = vld [vmem:[#allocation2 + $0x110] sm:$0xff] }
 0x33d   : > { %v1851_v48 = vmul.f32 %v1835_v1, %v1787_v34  ;;  %v1789_v60 = vmul.f32 0.5, %v1773_v62  ;;  %2859 = verf.f32 %v1806_v20  ;;  %v1563_v54 = vadd.f32 %v1547_v15, %v1510_v44  ;;  %v1740_v1 = vld [vmem:[#allocation2 + $0x111] sm:$0xff]  ;;  %v1635_v44 = vld [vmem:[#allocation2 + $0x127] sm:$0xff] }
 0x33e   : > { %v1548_v26 = vmul.f32 %v3996_v37, %v4299_v17  ;;  %v1722_v42 = vadd.f32 %v1706_v9, %v1669_v58  ;;  %v1458_v6 = vadd.f32 %v1442_v51, %v1405_v22  ;;  %v1330_v34 = vmul.f32 %v3974_v18, %v3965_v47 }
 0x33f   : > { %v2856_v56 = vpop.eup %2855  ;;  %2590 = vmatmul.mubr.f32.gmra.mxu1 %v1851_v48  ;;  %v1390_v8 = vmul.f32 %v3983_v61, %v4273_v2  ;;  %v1616_v36 = vadd.f32 %v1600_v41, %v1563_v54  ;;  %v1707_v7 = vmul.f32 %v4020_v35, %v1686_v29  ;;  %v1601_v62 = vmul.f32 %v4000_v23, %v4311_v19  ;;  %v1688_v29 = vld [vmem:[#allocation2 + $0x128] sm:$0xff] }
 0x340   : > { %v1836_v14 = vadd.f32 1.0, %v2856_v56  ;;  %v4341_v16 = vadd.f32 %v1759_v3, %v1722_v42  ;;  %v1511_v33 = vadd.f32 %v1495_v52, %v1458_v6  ;;  %v1353_v0 = vadd.f32 %v3979_v49, %v1330_v34 }
 0x341   : > { %v1443_v47 = vmul.f32 %v3990_v59, %v4275_v31  ;;  %v1670_v5 = vadd.f32 %v1654_v24, %v1616_v36  ;;  %v1760_v2 = vmul.f32 %v4028_v50, %v1739_v27  ;;  %v1655_v46 = vmul.f32 %v4004_v10, %v1634_v57 }
 0x342   : > { %v1852_v9 = vmul.f32 %v1836_v14, %v1788_v25  ;;  %v1807_v11 = vmul.f32 0.70710677, %v4341_v16  ;;  %v1564_v28 = vadd.f32 %v1548_v26, %v1511_v33  ;;  %v1406_v21 = vadd.f32 %v1390_v8, %v1353_v0  ;;  %v1636_v14 = vld [vmem:[#allocation2 + $0x12f] sm:$0xff] }
 0x343   : > { %v1496_v39 = vmul.f32 %v3992_v13, %v4284_v12  ;;  %v1723_v3 = vadd.f32 %v1707_v7, %v1670_v5  ;;  %v1708_v53 = vmul.f32 %v4020_v35, %v1687_v30  ;;  %v1549_v15 = vmul.f32 %v3996_v37, %v1633_v63  ;;  %v1742_v30 = vld [vmem:[#allocation2 + $0x131] sm:$0xff] }
 0x344   : > { %2592 = vmatprep.mubr.f32.mxu1 %v1852_v9  ;;  %v1331_v31 = vmul.f32 %v3974_v18, %v3962_v43  ;;  %2861 = verf.f32 %v1807_v11  ;;  %v1617_v25 = vadd.f32 %v1601_v62, %v1564_v28  ;;  %v1459_v55 = vadd.f32 %v1443_v47, %v1406_v21  ;;  %v1689_v62 = vld [vmem:[#allocation2 + $0x130] sm:$0xff] }
 0x345   : > { %v1391_v32 = vmul.f32 %v3983_v61, %v4299_v17  ;;  %v2858_v51 = vpop.eup %2857  ;;  %v1776_v20 = vadd.f32 %v1760_v2, %v1723_v3  ;;  %v1761_v12 = vmul.f32 %v4028_v50, %v1740_v1  ;;  %v1444_v63 = vmul.f32 %v3990_v59, %v4305_v40  ;;  %v1741_v59 = vld [vmem:[#allocation2 + $0x129] sm:$0xff] }
 0x346   : > { %v1354_v41 = vadd.f32 %v3979_v49, %v1331_v31  ;;  %v1837_v24 = vadd.f32 1.0, %v2858_v51  ;;  %v1671_v48 = vadd.f32 %v1655_v46, %v1617_v25  ;;  %v1512_v43 = vadd.f32 %v1496_v39, %v1459_v55 }
 0x347   : > { %v1602_v18 = vmul.f32 %v4000_v23, %v1739_v27  ;;  %v1808_v58 = vmul.f32 0.70710677, %v1776_v20  ;;  %v1497_v61 = vmul.f32 %v3992_v13, %v4311_v19  ;;  %v1656_v26 = vmul.f32 %v4004_v10, %v1635_v44 }
 0x348   : > { %v1407_v22 = vadd.f32 %v1391_v32, %v1354_v41  ;;  %v1853_v17 = vmul.f32 %v1837_v24, %v1789_v60  ;;  %v1724_v52 = vadd.f32 %v1708_v53, %v1671_v48  ;;  %v1565_v54 = vadd.f32 %v1549_v15, %v1512_v43  ;;  %v4377_v48 = vld [vmem:[%s4596_s27] ss:$0 sm:$0xff] }
 0x349   : > { %v1790_v49 = vmul.f32 0.5, %v4317_v4  ;;  %2863 = verf.f32 %v1808_v58  ;;  %v1550_v56 = vmul.f32 %v3996_v37, %v1634_v57  ;;  %v1709_v8 = vmul.f32 %v4020_v35, %v1688_v29 }
 0x34a   : > { %v1460_v40 = vadd.f32 %v1444_v63, %v1407_v22  ;;  %v2860_v42 = vpop.eup %2859  ;;  %2593 = vmatmul.mubr.f32.gmra.mxu1 %v1853_v17  ;;  %v1777_v6 = vadd.f32 %v1761_v12, %v1724_v52  ;;  %v1618_v34 = vadd.f32 %v1602_v18, %v1565_v54  ;;  %v1603_v60 = vmul.f32 %v4000_v23, %v1740_v1  ;;  %v4597_v17 = vld [vmem:[#allocation32_spill] sm:$0xff] }
 0x34b   : > { %v1838_v13 = vadd.f32 1.0, %v2860_v42  ;;  %v1762_v4 = vmul.f32 %v4028_v50, %v1741_v59  ;;  %v1657_v37 = vmul.f32 %v4004_v10, %v1636_v14  ;;  %v1710_v47 = vmul.f32 %v4020_v35, %v1689_v62 }
 0x34c   : > { %v1513_v19 = vadd.f32 %v1497_v61, %v1460_v40  ;;  %v1809_v36 = vmul.f32 0.70710677, %v1777_v6  ;;  %v1672_v7 = vadd.f32 %v1656_v26, %v1618_v34  ;;  %v1791_v9 = vmul.f32 0.5, %v4341_v16  ;;  %v4599_v40 = vld [vmem:[#allocation34_spill] sm:$0xff]  ;;  %v4600_v34 = vld [vmem:[#allocation35_spill] sm:$0xff] }
 0x34d   : > { %v1854_v27 = vmul.f32 %v1838_v13, %v1790_v49  ;;  %v1763_v46 = vmul.f32 %v4028_v50, %v1742_v30  ;;  %v1792_v10 = vmul.f32 0.5, %v1776_v20  ;;  %v1793_v35 = vmul.f32 0.5, %v1777_v6  ;;  %v4598_v49 = vld [vmem:[#allocation33_spill] sm:$0xff] }
 0x34e   : > { %v1566_v33 = vadd.f32 %v1550_v56, %v1513_v19  ;;  %2865 = verf.f32 %v1809_v36  ;;  %v1725_v57 = vadd.f32 %v1709_v8, %v1672_v7  ;;  %v4601_v19 = vld [vmem:[#allocation36_spill] sm:$0xff] }
 0x34f   : > { %2595 = vmatprep.mubr.f32.mxu1 %v1854_v27 }
 0x350   : > { %v1619_v0 = vadd.f32 %v1603_v60, %v1566_v33  ;;  %v1778_v5 = vadd.f32 %v1762_v4, %v1725_v57  ;;  %v4602_v4 = vld [vmem:[#allocation37_spill] sm:$0xff] }
 0x351   : > { %v2862_v23 = vpop.eup %2861 }
 0x352   : > { %v1673_v2 = vadd.f32 %v1657_v37, %v1619_v0  ;;  %v1839_v11 = vadd.f32 1.0, %v2862_v23  ;;  %v1810_v28 = vmul.f32 0.70710677, %v1778_v5  ;;  %v1794_v50 = vmul.f32 0.5, %v1778_v5  ;;  %v4603_v37 = vld [vmem:[#allocation38_spill] sm:$0xff] }
 0x354   : > { %v1726_v21 = vadd.f32 %v1710_v47, %v1673_v2  ;;  %v1855_v39 = vmul.f32 %v1839_v11, %v1791_v9  ;;  %2867 = verf.f32 %v1810_v28  ;;  %v4604_v47 = vld [vmem:[#allocation39_spill] sm:$0xff]  ;;  %v4606_v2 = vld [vmem:[#allocation40_spill] sm:$0xff] }
 0x356   : > { %v1779_v3 = vadd.f32 %v1763_v46, %v1726_v21  ;;  %v2864_v53 = vpop.eup %2863  ;;  %2596 = vmatmul.mubr.f32.gmra.mxu1 %v1855_v39  ;;  %v4608_v21 = vld [vmem:[#allocation41_spill] sm:$0xff] }
 0x357   : > { %v1840_v15 = vadd.f32 1.0, %v2864_v53  ;;  %v4609_v53 = vld [vmem:[#allocation42_spill] sm:$0xff] }
 0x358   : > { %v1811_v31 = vmul.f32 0.70710677, %v1779_v3  ;;  %v1795_v44 = vmul.f32 0.5, %v1779_v3 }
 0x359   : > { %v1856_v25 = vmul.f32 %v1840_v15, %v1792_v10 }
 0x35a   : > { %2869 = verf.f32 %v1811_v31 }
 0x35b   : > { %v2866_v16 = vpop.eup %2865  ;;  %2598 = vmatprep.mubr.f32.mxu1 %v1856_v25 }
 0x35c   : > { %v1841_v1 = vadd.f32 1.0, %v2866_v16 }
 0x35e   : > { %v1857_v55 = vmul.f32 %v1841_v1, %v1793_v35  ;;  %v4610_v35 = vld [vmem:[#allocation43_spill] sm:$0xff] }
 0x360   : > { %2599 = vmatmul.mubr.f32.gmra.mxu1 %v1857_v55 }
 0x361   : > { %v2868_v32 = vpop.eup %2867 }
 0x362   : > { %v1842_v51 = vadd.f32 1.0, %v2868_v32 }
 0x364   : > { %v1858_v12 = vmul.f32 %v1842_v51, %v1794_v50  ;;  %v4612_v50 = vld [vmem:[#allocation44_spill] sm:$0xff] }
 0x366   : > { %2601 = vmatprep.mubr.f32.mxu1 %v1858_v12 }
 0x367   : > { %v2870_v20 = vpop.eup %2869 }
 0x368   : > { %v1843_v41 = vadd.f32 1.0, %v2870_v20 }
 0x36a   : > { %v1859_v63 = vmul.f32 %v1843_v41, %v1795_v44  ;;  %v4613_v44 = vld [vmem:[#allocation45_spill] sm:$0xff] }
 0x36c   : > { %2602 = vmatmul.mubr.f32.gmra.mxu1 %v1859_v63 }
 0x3e3   : > { %v2582_v24 = vpop.f32.mrf.mxu1 }
 0x3e4   : > { %v1948_v43 = vadd.f32 %v2582_v24, %v3827_v38 }
 0x3e5   : > { %v1942_v18 = vpop.f32.mrf.mxu1 }
 0x3e6   : > { %v2029_v58 = vadd.f32 %v4377_v48, %v1948_v43  ;;  %v1943_v29 = vadd.f32 %v1942_v18, %v3829_v45 }
 0x3e7   : > { %v2585_v22 = vpop.f32.mrf.mxu1 }
 0x3e8   : > { %2045 = vst [vmem:[%s3970_s24 + $0x8] sm:$0xff] %v2029_v58  ;;  %v2028_v61 = vadd.f32 %v4377_v48, %v1943_v29  ;;  %v1958_v52 = vadd.f32 %v2585_v22, %v4597_v17 }
 0x3e9   : > { %v1952_v54 = vpop.f32.mrf.mxu1 }
 0x3ea   : > { %2044 = vst [vmem:[%s3970_s24] sm:$0xff] %v2028_v61  ;;  %v2031_v26 = vadd.f32 %v4377_v48, %v1958_v52  ;;  %v1953_v59 = vadd.f32 %v1952_v54, %v4598_v49 }
 0x3ec   : > { %2047 = vst [vmem:[%s3970_s24 + $0x18] sm:$0xff] %v2031_v26  ;;  %v2030_v38 = vadd.f32 %v4377_v48, %v1953_v59 }
 0x3ee   : > { %2046 = vst [vmem:[%s3970_s24 + $0x10] sm:$0xff] %v2030_v38 }
 0x3f2   : > { %v2588_v45 = vpop.f32.mrf.mxu1 }
 0x3f3   : > { %v1968_v56 = vadd.f32 %v2588_v45, %v4599_v40 }
 0x3f4   : > { %v1962_v42 = vpop.f32.mrf.mxu1 }
 0x3f5   : > { %v2033_v6 = vadd.f32 %v4377_v48, %v1968_v56  ;;  %v1963_v8 = vadd.f32 %v1962_v42, %v4600_v34 }
 0x3f7   : > { %2049 = vst [vmem:[%s3970_s24 + $0x28] sm:$0xff] %v2033_v6  ;;  %v2032_v14 = vadd.f32 %v4377_v48, %v1963_v8 }
 0x3f9   : > { %2048 = vst [vmem:[%s3970_s24 + $0x20] sm:$0xff] %v2032_v14 }
 0x3ff   : > { %v2591_v13 = vpop.f32.mrf.mxu1 }
 0x400   : > { %v1978_v60 = vadd.f32 %v2591_v13, %v4601_v19 }
 0x401   : > { %v1972_v36 = vpop.f32.mrf.mxu1 }
 0x402   : > { %v2035_v7 = vadd.f32 %v4377_v48, %v1978_v60  ;;  %v1973_v62 = vadd.f32 %v1972_v36, %v4602_v4 }
 0x404   : > { %2051 = vst [vmem:[%s3970_s24 + $0x38] sm:$0xff] %v2035_v7  ;;  %v2034_v27 = vadd.f32 %v4377_v48, %v1973_v62 }
 0x406   : > { %2050 = vst [vmem:[%s3970_s24 + $0x30] sm:$0xff] %v2034_v27 }
 0x40a   : > { %v2594_v33 = vpop.f32.mrf.mxu1 }
 0x40b   : > { %v1988_v57 = vadd.f32 %v2594_v33, %v4603_v37 }
 0x40c   : > { %v1982_v30 = vpop.f32.mrf.mxu1 }
 0x40d   : > { %v2037_v0 = vadd.f32 %v4377_v48, %v1988_v57  ;;  %v1983_v9 = vadd.f32 %v1982_v30, %v4604_v47 }
 0x40f   : > { %2053 = vst [vmem:[%s3970_s24 + $0x48] sm:$0xff] %v2037_v0  ;;  %v2036_v5 = vadd.f32 %v4377_v48, %v1983_v9 }
 0x411   : > { %2052 = vst [vmem:[%s3970_s24 + $0x40] sm:$0xff] %v2036_v5 }
 0x416   : > { %v2597_v23 = vpop.f32.mrf.mxu1 }
 0x417   : > { %v1998_v46 = vadd.f32 %v2597_v23, %v4606_v2 }
 0x418   : > { %v1992_v11 = vpop.f32.mrf.mxu1 }
 0x419   : > { %v2039_v28 = vadd.f32 %v4377_v48, %v1998_v46  ;;  %v1993_v39 = vadd.f32 %v1992_v11, %v4608_v21 }
 0x41b   : > { %2055 = vst [vmem:[%s3970_s24 + $0x58] sm:$0xff] %v2039_v28  ;;  %v2038_v10 = vadd.f32 %v4377_v48, %v1993_v39 }
 0x41d   : > { %2054 = vst [vmem:[%s3970_s24 + $0x50] sm:$0xff] %v2038_v10 }
 0x420   : > { %v2600_v3 = vpop.f32.mrf.mxu1 }
 0x421   : > { %v2008_v15 = vadd.f32 %v2600_v3, %v4609_v53 }
 0x422   : > { %v2002_v31 = vpop.f32.mrf.mxu1 }
 0x423   : > { %v2041_v25 = vadd.f32 %v4377_v48, %v2008_v15  ;;  %v2003_v16 = vadd.f32 %v2002_v31, %v4610_v35 }
 0x425   : > { %2057 = vst [vmem:[%s3970_s24 + $0x68] sm:$0xff] %v2041_v25  ;;  %v2040_v1 = vadd.f32 %v4377_v48, %v2003_v16 }
 0x427   : > { %2056 = vst [vmem:[%s3970_s24 + $0x60] sm:$0xff] %v2040_v1 }
 0x42c   : > { %v2603_v55 = vpop.f32.mrf.mxu1 }
 0x42d   : > { %v2018_v32 = vadd.f32 %v2603_v55, %v4612_v50 }
 0x42e   : > { %v2012_v51 = vpop.f32.mrf.mxu1 }
 0x42f   : > { %v2043_v12 = vadd.f32 %v4377_v48, %v2018_v32  ;;  %v2013_v20 = vadd.f32 %v2012_v51, %v4613_v44 }
 0x431   : > { %2059 = vst [vmem:[%s3970_s24 + $0x78] sm:$0xff] %v2043_v12  ;;  %v2042_v41 = vadd.f32 %v4377_v48, %v2013_v20 }
 0x433   : > { %2058 = vst [vmem:[%s3970_s24 + $0x70] sm:$0xff] %v2042_v41 }
 0x434   : > { %3044 = shalt.err (!%p3041_p4)
}
 0x435   : > { %s3045_s24 = scalar_lea.hbm %s4430_s17, 2048  ;;  %s3049_s7 = scalar_lea.hbm %s4615_s28, 8192 }
 0x436   : > { %p3046_p8 = scmp.ne.s32.totalorder %s4430_s17, %s3045_s24  ;;  %p3050_p7 = scmp.lt.s32.totalorder %s4430_s17, %s4615_s28 }
 0x437   : > { %p3051_p5 = scmp.lt.s32.totalorder %s3049_s7, %s3045_s24 }
 0x438   : > { %p3047_p2 = pnand %p3046_p8, %p4616_p0 }
 0x439   : > { %p3052_p11 = por %p3051_p5, %p3050_p7 }
 0x43a   : > { %p3048_p13 = pneg %p3047_p2 }
 0x43c   : > { %p3053_p1 = pnand %p3052_p11, %p3048_p13 }
 0x43e   : > { %3056 = shalt.err (!%p3053_p1)
}
 0x43f   : > { %s3181_s22 = smov 128   ;;  %s3182_s6 = smov 8  }
 0x440   : > { %2624 = dma.vmem_to_hbm [thread:$0]  (%p4616_p0), %s4432_s23, 2048, %s4430_s17, %s2061_s12, %s3181_s22, %s3181_s22, %s3182_s6  }
 0x441 PF: > { %s4617_s29 = sld [smem:[#allocation22_spill]]  ;;  %p2659_p10 = scmp.ge.s32.totalorder %s3167_s19, 2 }
 0x442   : > { %s4618_s8 = sld [smem:[#allocation31_spill]] }
 0x447   : > { %s2092_s4 = sand.u32 1, %s4617_s29  }
 0x448   : > { %p4619_p12 = scmp.ne.s32.totalorder %s4618_s8, 0  ;;  %s2093_s16 = scalar_lea.sflag [#allocation5], %s2092_s4 }
 0x44a   : > { %p2647_p9 = pnand %p2659_p10, %p4619_p12 }
 0x44c   : > { %p2648_p3 = pneg %p2647_p9 }
 0x44e   : > { %3122 = dma.done.wait (%p2648_p3), %s2093_s16, 2048  }
 0x44f   : > { %3124 = vsyncadd (%p2648_p3), %s2093_s16, 4294965248  ;;  %s30_s19 = sadd.s32 1, %s3167_s19   ;;  %s4620_s30 = sld [smem:[#allocation21_spill]] }
 0x450   : > { %p27_p6 = scmp.ge.s32.totalorder %s30_s19, 6   ;;  %s4621_s12 = sld [smem:[#allocation23_spill]] }
 0x451   : > { %s4622_s2 = sld [smem:[#allocation26_spill]]  ;;  %s4623_s10 = smov %s3135_s11 }
 0x452   : > { %s4624_s11 = smov %s3441_s15  ;;  %s4625_s13 = smov %s3147_s14 }
 0x453   : > { %s4626_s14 = smov %s3438_s5  ;;  %s4628_s16 = smov %s3163_s18 }
 0x454   : > { %s4629_s17 = smov %s4632_s9  ;;  %s4630_s18 = smov %s4636_s26 }
 0x455   :  { %29 = sbr.rel (!%p27_p6) target bundleno = 23 (0x17), region = 141 }
 0x457   : > { %s4627_s15 = smov %s4622_s2 }
 0x45a   :  { %2098 = vsyncpa [#allocation4], 1 }
 0x45b   :  { %2100 = vsyncpa [#allocation4 + $0x1], 1 }
 0x45c   :  { %2101 = vsyncpa [#allocation7], 1 }
 0x45d   :  { %2103 = vsyncpa [#allocation7 + $0x1], 1 }
 0x45e   :  { %2104 = vsyncpa [#allocation10], 1 }
 0x45f   :  { %2105 = vsyncpa [#allocation13], 1 }
 0x460   :  { %2106 = vsyncpa [#allocation5], 1 }
 0x461   :  { %2108 = vsyncpa [#allocation5 + $0x1], 1 }

</bundles_post_ra>
